<compile_context>
chip_gen: v6e
topology: v6e:2x2x1
jax: 0.10.0
libtpu: 0.0.40
codegen_flags: <defaults>
</compile_context>

<pallas_src>
import functools

import jax
import jax.numpy as jnp
from jax.experimental import pallas as pl
from jax.experimental.pallas import tpu as pltpu

LN_EPS = 1e-5
GIN_EPS = 0.0  # DGL GINConv default: init_eps=0, learn_eps=False (baked in at trace time)


def _round_up(x, m):
    return ((x + m - 1) // m) * m


def _choose_tiles(n):
    """Pad N to a multiple of 128; pick tm|n_pad (<=512) and tk|n_pad (<=2048).

    Guarantees >=2 row tiles when n_pad >= 256 so v7x's two TensorCores both get
    work on the 'parallel' row axis (harmless on single-TC v5e/v6e).
    """
    n_pad = _round_up(n, 128)
    m = n_pad // 128

    def pick(cap, min_tiles):
        best = 128
        for a in range(1, m + 1):
            if m % a == 0:
                t = 128 * a
                if t <= cap and (n_pad // t) >= min_tiles:
                    best = max(best, t)
        return best

    tm = pick(512, 2 if n_pad >= 256 else 1)
    tk = pick(2048, 1)
    return n_pad, tm, tk


def _vmem_limit_bytes():
    """~3/4 of physical VMEM, capped at 100 MiB (v7x: 48 MiB, v5e/v6e: 96 MiB)."""
    default_cap = 64 * 1024 * 1024
    try:
        info = pltpu.get_tpu_info()
        cap = int(getattr(info, "vmem_capacity_bytes", default_cap))
    except Exception:  # pragma: no cover - conservative fallback
        cap = default_cap
    return min((cap * 3) // 4, 100 * 1024 * 1024)


def _gin_layer_kernel(adj_ref, h_ref, w1_ref, b1_ref, gamma_ref, beta_ref,
                      w2_ref, b2_ref, out_ref, acc_ref, *, hidden_real, tk):
    k = pl.program_id(1)

    @pl.when(k == 0)
    def _():
        acc_ref[...] = jnp.zeros_like(acc_ref)

    # Neighbor + self aggregation: (A + (1+eps) I) @ h, accumulated over the K axis.
    # adj tile is int8 in HBM/VMEM; upcast to bf16 for the MXU (VPU filler under DMA).
    a_tile = adj_ref[...].astype(jnp.bfloat16)
    k_start = pl.multiple_of(k * tk, tk)
    h_tile = h_ref[pl.ds(k_start, tk), :]          # h is VMEM-resident; slice, no DMA
    acc_ref[...] += jnp.dot(a_tile, h_tile, preferred_element_type=jnp.float32)

    @pl.when(k == pl.num_programs(1) - 1)
    def _():
        z = acc_ref[...]                            # self term already folded into adj

        # MLP layer 1 (bf16 MXU inputs, f32 accumulate)
        x = jnp.dot(z.astype(jnp.bfloat16), w1_ref[...],
                    preferred_element_type=jnp.float32) + b1_ref[...]

        # LayerNorm over the real hidden dim. Padded columns of x are exactly zero
        # (W1/b1 padding is zero), so plain sums / hidden_real give correct stats.
        inv_h = 1.0 / float(hidden_real)
        mu = jnp.sum(x, axis=-1, keepdims=True) * inv_h
        ms = jnp.sum(x * x, axis=-1, keepdims=True) * inv_h
        var = ms - mu * mu
        xn = (x - mu) * jax.lax.rsqrt(var + LN_EPS)
        xn = xn * gamma_ref[...] + beta_ref[...]    # gamma/beta zero in padded columns

        a = jnp.maximum(xn, 0.0)                    # ReLU

        # MLP layer 2
        out = jnp.dot(a.astype(jnp.bfloat16), w2_ref[...],
                      preferred_element_type=jnp.float32) + b2_ref[...]
        out_ref[...] = out.astype(out_ref.dtype)


def gin_layer(adj_p, h_p, params_p, *, n_pad, tm, tk, hidden_real, out_dtype):
    """One GINConv(MlpBlock) layer over a padded graph, tiled over (rows, K)."""
    w1, b1, gamma, beta, w2, b2 = params_p
    fin_p = h_p.shape[1]
    hid_p = w1.shape[1]
    fout_p = w2.shape[1]
    grid = (n_pad // tm, n_pad // tk)

    kernel = functools.partial(_gin_layer_kernel, hidden_real=hidden_real, tk=tk)

    flops = (2 * n_pad * n_pad * fin_p
             + 2 * n_pad * fin_p * hid_p
             + 2 * n_pad * hid_p * fout_p)
    bytes_accessed = (adj_p.size * adj_p.dtype.itemsize          # int8 adjacency, read once
                      + h_p.size * h_p.dtype.itemsize            # resident h, read once
                      + sum(p.size * p.dtype.itemsize for p in params_p)
                      + n_pad * fout_p * jnp.dtype(out_dtype).itemsize)

    return pl.pallas_call(
        kernel,
        out_shape=jax.ShapeDtypeStruct((n_pad, fout_p), out_dtype),
        grid_spec=pltpu.PrefetchScalarGridSpec(
            num_scalar_prefetch=0,
            grid=grid,
            in_specs=[
                pl.BlockSpec((tm, tk), lambda i, k: (i, k)),          # adj tile (int8)
                pl.BlockSpec((n_pad, fin_p), lambda i, k: (0, 0)),    # h (fully resident)
                pl.BlockSpec((fin_p, hid_p), lambda i, k: (0, 0)),    # w1 (resident)
                pl.BlockSpec((1, hid_p), lambda i, k: (0, 0)),        # b1
                pl.BlockSpec((1, hid_p), lambda i, k: (0, 0)),        # gamma
                pl.BlockSpec((1, hid_p), lambda i, k: (0, 0)),        # beta
                pl.BlockSpec((hid_p, fout_p), lambda i, k: (0, 0)),   # w2 (resident)
                pl.BlockSpec((1, fout_p), lambda i, k: (0, 0)),       # b2
            ],
            out_specs=pl.BlockSpec((tm, fout_p), lambda i, k: (i, 0)),
            scratch_shapes=[pltpu.VMEM((tm, fin_p), jnp.float32)],
        ),
        compiler_params=pltpu.CompilerParams(
            dimension_semantics=("parallel", "arbitrary"),
            vmem_limit_bytes=_vmem_limit_bytes(),
        ),
        cost_estimate=pl.CostEstimate(
            flops=flops, transcendentals=n_pad, bytes_accessed=bytes_accessed),
    )(adj_p, h_p, w1, b1, gamma, beta, w2, b2)


def _pad2(x, rows, cols, dtype=None):
    y = jnp.pad(x, ((0, rows - x.shape[0]), (0, cols - x.shape[1])))
    return y.astype(dtype) if dtype is not None else y


def init_mlp_params(key, in_dim, hidden_dim, out_dim):
    k1, k2 = jax.random.split(key)
    scale1 = 1.0 / jnp.sqrt(in_dim)
    scale2 = 1.0 / jnp.sqrt(hidden_dim)
    w1 = jax.random.uniform(k1, (in_dim, hidden_dim), jnp.float32, -scale1, scale1)
    b1 = jnp.zeros((1, hidden_dim), jnp.float32)
    gamma = jnp.ones((1, hidden_dim), jnp.float32)
    beta = jnp.zeros((1, hidden_dim), jnp.float32)
    w2 = jax.random.uniform(k2, (hidden_dim, out_dim), jnp.float32, -scale2, scale2)
    b2 = jnp.zeros((1, out_dim), jnp.float32)
    return (w1, b1, gamma, beta, w2, b2)


def init_agfnn_gin_params(key, in_feats, hidden_size, out_size, num_layers):
    keys = jax.random.split(key, num_layers)
    params = [init_mlp_params(keys[0], in_feats, hidden_size, hidden_size)]
    for i in range(num_layers - 2):
        params.append(init_mlp_params(keys[i + 1], hidden_size, hidden_size, hidden_size))
    params.append(init_mlp_params(keys[num_layers - 1], hidden_size, hidden_size, out_size))
    return params


@jax.jit
def agfnn_gin_forward(adj, features, params):
    n, fin = features.shape
    n_pad, tm, tk = _choose_tiles(n)

    # Fold the GIN self term into the adjacency: A' = A + (1+eps) I (eps fixed at 0).
    # int8 is exact for 0/1 adjacency; a weighted graph would need bf16 here.
    adj_self = adj + (1.0 + GIN_EPS) * jnp.eye(n, dtype=adj.dtype)
    adj_p = _pad2(adj_self, n_pad, n_pad).astype(jnp.int8)

    # Node features: padded columns must be exactly zero (LayerNorm-over-padding trick).
    h = _pad2(features, n_pad, _round_up(fin, 128)).astype(jnp.bfloat16)

    num_layers = len(params)
    for li, layer_params in enumerate(params):
        w1, b1, gamma, beta, w2, b2 = layer_params
        fin_r, hid_r = w1.shape
        fout_r = w2.shape[1]
        fin_p = _round_up(fin_r, 128)
        hid_p = _round_up(hid_r, 128)
        fout_p = _round_up(fout_r, 128)
        pp = (
            _pad2(w1, fin_p, hid_p, jnp.bfloat16),   # zero-padded -> padded x cols are 0
            _pad2(b1, 1, hid_p),
            _pad2(gamma, 1, hid_p),                  # zero-padded: padded LN columns stay 0
            _pad2(beta, 1, hid_p),
            _pad2(w2, hid_p, fout_p, jnp.bfloat16),
            _pad2(b2, 1, fout_p),
        )
        out_dtype = jnp.float32 if li == num_layers - 1 else jnp.bfloat16
        h = gin_layer(adj_p, h, pp, n_pad=n_pad, tm=tm, tk=tk,
                      hidden_real=hid_r, out_dtype=out_dtype)

    out_real = params[-1][4].shape[1]
    return h[:n, :out_real]


def _reference_forward(adj, features, params):
    """Pure-JAX f32 reference of the same forward pass (for a loose sanity check)."""
    h = features
    for (w1, b1, gamma, beta, w2, b2) in params:
        z = (1.0 + GIN_EPS) * h + adj @ h
        x = z @ w1 + b1
        mu = jnp.mean(x, axis=-1, keepdims=True)
        var = jnp.mean((x - mu) ** 2, axis=-1, keepdims=True)
        xn = (x - mu) / jnp.sqrt(var + LN_EPS)
        xn = xn * gamma + beta
        h = jnp.maximum(xn, 0.0) @ w2 + b2
    return h


if __name__ == "__main__":
    key = jax.random.PRNGKey(0)
    k_adj, k_feat, k_param = jax.random.split(key, 3)

    # small synthetic graph
    N = 32
    in_feats = 16
    hidden = 32
    out_size = 16
    num_layers = 3

    # symmetric 0/1 adjacency (no self loops; GIN adds (1+eps)*self explicitly)
    a = (jax.random.uniform(k_adj, (N, N)) < 0.2).astype(jnp.float32)
    adj = jnp.clip(a + a.T, 0.0, 1.0) * (1.0 - jnp.eye(N, dtype=jnp.float32))

    features = jax.random.normal(k_feat, (N, in_feats), jnp.float32)
    params = init_agfnn_gin_params(k_param, in_feats, hidden, out_size, num_layers)

    out = agfnn_gin_forward(adj, features, params)
    jax.block_until_ready(out)
    assert out.shape == (N, out_size)
    assert bool(jnp.all(jnp.isfinite(out)))

    # Loose sanity check vs f32 reference (kernel uses bf16 matmul inputs).
    ref = _reference_forward(adj, features, params)
    assert float(jnp.max(jnp.abs(out - ref))) < 0.25

    print("KERNEL_OK")
</pallas_src>

<mosaic_0001>
module attributes {stable_mosaic.version = 11 : i64} {
  func.func @_gin_layer_kernel(%arg0: i32, %arg1: i32, %arg2: memref<128x128xi8, #tpu.memory_space<vmem>>, %arg3: memref<128x128xbf16, #tpu.memory_space<vmem>>, %arg4: memref<128x128xbf16, #tpu.memory_space<vmem>>, %arg5: memref<1x128xf32, #tpu.memory_space<vmem>>, %arg6: memref<1x128xf32, #tpu.memory_space<vmem>>, %arg7: memref<1x128xf32, #tpu.memory_space<vmem>>, %arg8: memref<128x128xbf16, #tpu.memory_space<vmem>>, %arg9: memref<1x128xf32, #tpu.memory_space<vmem>>, %arg10: memref<128x128xbf16, #tpu.memory_space<vmem>>, %arg11: memref<128x128xf32, #tpu.memory_space<vmem>>) attributes {dimension_semantics = [#tpu.dimension_semantics<parallel>, #tpu.dimension_semantics<arbitrary>], iteration_bounds = array<i64: 1, 1>, scalar_prefetch = 0 : i64, scratch_operands = 1 : i64, tpu.core_type = #tpu.core_type<tc>, window_params = [{transform_indices = @transform_0, window_bounds = array<i64: 128, 128>}, {pipeline_mode = #tpu.pipeline_mode<synchronous>, transform_indices = @transform_1, window_bounds = array<i64: 128, 128>}, {pipeline_mode = #tpu.pipeline_mode<synchronous>, transform_indices = @transform_2, window_bounds = array<i64: 128, 128>}, {pipeline_mode = #tpu.pipeline_mode<synchronous>, transform_indices = @transform_3, window_bounds = array<i64: 1, 128>}, {pipeline_mode = #tpu.pipeline_mode<synchronous>, transform_indices = @transform_4, window_bounds = array<i64: 1, 128>}, {pipeline_mode = #tpu.pipeline_mode<synchronous>, transform_indices = @transform_5, window_bounds = array<i64: 1, 128>}, {pipeline_mode = #tpu.pipeline_mode<synchronous>, transform_indices = @transform_6, window_bounds = array<i64: 128, 128>}, {pipeline_mode = #tpu.pipeline_mode<synchronous>, transform_indices = @transform_7, window_bounds = array<i64: 1, 128>}, {transform_indices = @transform_8, window_bounds = array<i64: 128, 128>}]} {
    %c0_i32 = arith.constant 0 : i32
    %0 = arith.cmpi eq, %arg1, %c0_i32 : i32
    %1 = arith.extui %0 : i1 to i32
    %c0_i32_0 = arith.constant 0 : i32
    %2 = arith.cmpi ne, %1, %c0_i32_0 : i32
    scf.if %2 {
      %cst_9 = arith.constant 0.000000e+00 : f32
      %16 = vector.broadcast %cst_9 : f32 to vector<128x128xf32>
      %c0_10 = arith.constant 0 : index
      %c0_11 = arith.constant 0 : index
      %17 = vector.load %arg11[%c0_10, %c0_11] : memref<128x128xf32, #tpu.memory_space<vmem>>, vector<128x128xf32>
      tpu.vector_store %arg11[%c0_10, %c0_11], %16 {strides = array<i32>} : memref<128x128xf32, #tpu.memory_space<vmem>>, vector<128x128xf32>,
    } else {
    }
    %c0 = arith.constant 0 : index
    %c0_1 = arith.constant 0 : index
    %3 = vector.load %arg2[%c0, %c0_1] : memref<128x128xi8, #tpu.memory_space<vmem>>, vector<128x128xi8>
    %4 = arith.sitofp %3 : vector<128x128xi8> to vector<128x128xbf16>
    %c128_i32 = arith.constant 128 : i32
    %5 = arith.muli %arg1, %c128_i32 : i32
    %6 = tpu.assume_multiple %5, 128 : i32
    %7 = arith.index_cast %6 : i32 to index
    %c0_2 = arith.constant 0 : index
    %8 = vector.load %arg3[%7, %c0_2] : memref<128x128xbf16, #tpu.memory_space<vmem>>, vector<128x128xbf16>
    %c0_3 = arith.constant 0 : index
    %c0_4 = arith.constant 0 : index
    %9 = vector.load %arg11[%c0_3, %c0_4] : memref<128x128xf32, #tpu.memory_space<vmem>>, vector<128x128xf32>
    %cst = arith.constant dense<0.000000e+00> : vector<128x128xf32>
    %10 = tpu.matmul %4, %8, %cst {dimension_numbers = #tpu.dot_dimension_numbers<[1], [0], [0], [1], [0, 0, 1, 1], [], []>} : vector<128x128xbf16>, vector<128x128xbf16>, vector<128x128xf32> -> vector<128x128xf32>
    %11 = arith.addf %9, %10 : vector<128x128xf32>
    %c0_5 = arith.constant 0 : index
    %c0_6 = arith.constant 0 : index
    %12 = vector.load %arg11[%c0_5, %c0_6] : memref<128x128xf32, #tpu.memory_space<vmem>>, vector<128x128xf32>
    tpu.vector_store %arg11[%c0_5, %c0_6], %11 {strides = array<i32>} : memref<128x128xf32, #tpu.memory_space<vmem>>, vector<128x128xf32>,
    %c0_i32_7 = arith.constant 0 : i32
    %13 = arith.cmpi eq, %arg1, %c0_i32_7 : i32
    %14 = arith.extui %13 : i1 to i32
    %c0_i32_8 = arith.constant 0 : i32
    %15 = arith.cmpi ne, %14, %c0_i32_8 : i32
    scf.if %15 {
      %c0_9 = arith.constant 0 : index
      %c0_10 = arith.constant 0 : index
      %16 = vector.load %arg11[%c0_9, %c0_10] : memref<128x128xf32, #tpu.memory_space<vmem>>, vector<128x128xf32>
      %17 = arith.truncf %16 : vector<128x128xf32> to vector<128x128xbf16>
      %c0_11 = arith.constant 0 : index
      %c0_12 = arith.constant 0 : index
      %18 = vector.load %arg4[%c0_11, %c0_12] : memref<128x128xbf16, #tpu.memory_space<vmem>>, vector<128x128xbf16>
      %cst_13 = arith.constant dense<0.000000e+00> : vector<128x128xf32>
      %19 = tpu.matmul %17, %18, %cst_13 {dimension_numbers = #tpu.dot_dimension_numbers<[1], [0], [0], [1], [0, 0, 1, 1], [], []>} : vector<128x128xbf16>, vector<128x128xbf16>, vector<128x128xf32> -> vector<128x128xf32>
      %c0_14 = arith.constant 0 : index
      %c0_15 = arith.constant 0 : index
      %20 = vector.load %arg5[%c0_14, %c0_15] : memref<1x128xf32, #tpu.memory_space<vmem>>, vector<1x128xf32>
      %21 = vector.broadcast %20 : vector<1x128xf32> to vector<128x128xf32>
      %22 = arith.addf %19, %21 : vector<128x128xf32>
      %cst_16 = arith.constant dense<0.000000e+00> : vector<128xf32>
      %23 = vector.multi_reduction <add>, %22, %cst_16 [1] : vector<128x128xf32> to vector<128xf32>
      %24 = vector.shape_cast %23 : vector<128xf32> to vector<128x1xf32>
      %cst_17 = arith.constant 3.125000e-02 : f32
      %25 = vector.broadcast %cst_17 : f32 to vector<128x1xf32>
      %26 = arith.mulf %24, %25 : vector<128x1xf32>
      %27 = arith.mulf %22, %22 : vector<128x128xf32>
      %cst_18 = arith.constant dense<0.000000e+00> : vector<128xf32>
      %28 = vector.multi_reduction <add>, %27, %cst_18 [1] : vector<128x128xf32> to vector<128xf32>
      %29 = vector.shape_cast %28 : vector<128xf32> to vector<128x1xf32>
      %cst_19 = arith.constant 3.125000e-02 : f32
      %30 = vector.broadcast %cst_19 : f32 to vector<128x1xf32>
      %31 = arith.mulf %29, %30 : vector<128x1xf32>
      %32 = arith.mulf %26, %26 : vector<128x1xf32>
      %33 = arith.subf %31, %32 : vector<128x1xf32>
      %34 = vector.broadcast %26 : vector<128x1xf32> to vector<128x128xf32>
      %35 = arith.subf %22, %34 : vector<128x128xf32>
      %cst_20 = arith.constant 9.99999974E-6 : f32
      %36 = vector.broadcast %cst_20 : f32 to vector<128x1xf32>
      %37 = arith.addf %33, %36 : vector<128x1xf32>
      %38 = math.rsqrt %37 : vector<128x1xf32>
      %39 = vector.broadcast %38 : vector<128x1xf32> to vector<128x128xf32>
      %40 = arith.mulf %35, %39 : vector<128x128xf32>
      %c0_21 = arith.constant 0 : index
      %c0_22 = arith.constant 0 : index
      %41 = vector.load %arg6[%c0_21, %c0_22] : memref<1x128xf32, #tpu.memory_space<vmem>>, vector<1x128xf32>
      %42 = vector.broadcast %41 : vector<1x128xf32> to vector<128x128xf32>
      %43 = arith.mulf %40, %42 : vector<128x128xf32>
      %c0_23 = arith.constant 0 : index
      %c0_24 = arith.constant 0 : index
      %44 = vector.load %arg7[%c0_23, %c0_24] : memref<1x128xf32, #tpu.memory_space<vmem>>, vector<1x128xf32>
      %45 = vector.broadcast %44 : vector<1x128xf32> to vector<128x128xf32>
      %46 = arith.addf %43, %45 : vector<128x128xf32>
      %cst_25 = arith.constant 0.000000e+00 : f32
      %47 = vector.broadcast %cst_25 : f32 to vector<128x128xf32>
      %48 = arith.maximumf %46, %47 : vector<128x128xf32>
      %49 = arith.truncf %48 : vector<128x128xf32> to vector<128x128xbf16>
      %c0_26 = arith.constant 0 : index
      %c0_27 = arith.constant 0 : index
      %50 = vector.load %arg8[%c0_26, %c0_27] : memref<128x128xbf16, #tpu.memory_space<vmem>>, vector<128x128xbf16>
      %cst_28 = arith.constant dense<0.000000e+00> : vector<128x128xf32>
      %51 = tpu.matmul %49, %50, %cst_28 {dimension_numbers = #tpu.dot_dimension_numbers<[1], [0], [0], [1], [0, 0, 1, 1], [], []>} : vector<128x128xbf16>, vector<128x128xbf16>, vector<128x128xf32> -> vector<128x128xf32>
      %c0_29 = arith.constant 0 : index
      %c0_30 = arith.constant 0 : index
      %52 = vector.load %arg9[%c0_29, %c0_30] : memref<1x128xf32, #tpu.memory_space<vmem>>, vector<1x128xf32>
      %53 = vector.broadcast %52 : vector<1x128xf32> to vector<128x128xf32>
      %54 = arith.addf %51, %53 : vector<128x128xf32>
      %55 = arith.truncf %54 : vector<128x128xf32> to vector<128x128xbf16>
      %c0_31 = arith.constant 0 : index
      %c0_32 = arith.constant 0 : index
      %56 = vector.load %arg10[%c0_31, %c0_32] : memref<128x128xbf16, #tpu.memory_space<vmem>>, vector<128x128xbf16>
      tpu.vector_store %arg10[%c0_31, %c0_32], %55 {strides = array<i32>} : memref<128x128xbf16, #tpu.memory_space<vmem>>, vector<128x128xbf16>,
    } else {
    }
    return
  }
  func.func @transform_0(%arg0: i32, %arg1: i32) -> (i32, i32) {
    %c0_i32 = arith.constant 0 : i32
    return %arg0, %arg1 : i32, i32
  }
  func.func @transform_1(%arg0: i32, %arg1: i32) -> (i32, i32) {
    %c0_i32 = arith.constant 0 : i32
    %c0_i32_0 = arith.constant 0 : i32
    %c0_i32_1 = arith.constant 0 : i32
    return %c0_i32, %c0_i32_0 : i32, i32
  }
  func.func @transform_2(%arg0: i32, %arg1: i32) -> (i32, i32) {
    %c0_i32 = arith.constant 0 : i32
    %c0_i32_0 = arith.constant 0 : i32
    %c0_i32_1 = arith.constant 0 : i32
    return %c0_i32, %c0_i32_0 : i32, i32
  }
  func.func @transform_3(%arg0: i32, %arg1: i32) -> (i32, i32) {
    %c0_i32 = arith.constant 0 : i32
    %c0_i32_0 = arith.constant 0 : i32
    %c0_i32_1 = arith.constant 0 : i32
    return %c0_i32, %c0_i32_0 : i32, i32
  }
  func.func @transform_4(%arg0: i32, %arg1: i32) -> (i32, i32) {
    %c0_i32 = arith.constant 0 : i32
    %c0_i32_0 = arith.constant 0 : i32
    %c0_i32_1 = arith.constant 0 : i32
    return %c0_i32, %c0_i32_0 : i32, i32
  }
  func.func @transform_5(%arg0: i32, %arg1: i32) -> (i32, i32) {
    %c0_i32 = arith.constant 0 : i32
    %c0_i32_0 = arith.constant 0 : i32
    %c0_i32_1 = arith.constant 0 : i32
    return %c0_i32, %c0_i32_0 : i32, i32
  }
  func.func @transform_6(%arg0: i32, %arg1: i32) -> (i32, i32) {
    %c0_i32 = arith.constant 0 : i32
    %c0_i32_0 = arith.constant 0 : i32
    %c0_i32_1 = arith.constant 0 : i32
    return %c0_i32, %c0_i32_0 : i32, i32
  }
  func.func @transform_7(%arg0: i32, %arg1: i32) -> (i32, i32) {
    %c0_i32 = arith.constant 0 : i32
    %c0_i32_0 = arith.constant 0 : i32
    %c0_i32_1 = arith.constant 0 : i32
    return %c0_i32, %c0_i32_0 : i32, i32
  }
  func.func @transform_8(%arg0: i32, %arg1: i32) -> (i32, i32) {
    %c0_i32 = arith.constant 0 : i32
    %c0_i32_0 = arith.constant 0 : i32
    return %arg0, %c0_i32 : i32, i32
  }
}

module attributes {stable_mosaic.version = 11 : i64} {
  func.func @_gin_layer_kernel(%arg0: i32, %arg1: i32, %arg2: memref<128x128xi8, #tpu.memory_space<vmem>>, %arg3: memref<128x128xbf16, #tpu.memory_space<vmem>>, %arg4: memref<128x128xbf16, #tpu.memory_space<vmem>>, %arg5: memref<1x128xf32, #tpu.memory_space<vmem>>, %arg6: memref<1x128xf32, #tpu.memory_space<vmem>>, %arg7: memref<1x128xf32, #tpu.memory_space<vmem>>, %arg8: memref<128x128xbf16, #tpu.memory_space<vmem>>, %arg9: memref<1x128xf32, #tpu.memory_space<vmem>>, %arg10: memref<128x128xf32, #tpu.memory_space<vmem>>, %arg11: memref<128x128xf32, #tpu.memory_space<vmem>>) attributes {dimension_semantics = [#tpu.dimension_semantics<parallel>, #tpu.dimension_semantics<arbitrary>], iteration_bounds = array<i64: 1, 1>, scalar_prefetch = 0 : i64, scratch_operands = 1 : i64, tpu.core_type = #tpu.core_type<tc>, window_params = [{transform_indices = @transform_0, window_bounds = array<i64: 128, 128>}, {pipeline_mode = #tpu.pipeline_mode<synchronous>, transform_indices = @transform_1, window_bounds = array<i64: 128, 128>}, {pipeline_mode = #tpu.pipeline_mode<synchronous>, transform_indices = @transform_2, window_bounds = array<i64: 128, 128>}, {pipeline_mode = #tpu.pipeline_mode<synchronous>, transform_indices = @transform_3, window_bounds = array<i64: 1, 128>}, {pipeline_mode = #tpu.pipeline_mode<synchronous>, transform_indices = @transform_4, window_bounds = array<i64: 1, 128>}, {pipeline_mode = #tpu.pipeline_mode<synchronous>, transform_indices = @transform_5, window_bounds = array<i64: 1, 128>}, {pipeline_mode = #tpu.pipeline_mode<synchronous>, transform_indices = @transform_6, window_bounds = array<i64: 128, 128>}, {pipeline_mode = #tpu.pipeline_mode<synchronous>, transform_indices = @transform_7, window_bounds = array<i64: 1, 128>}, {transform_indices = @transform_8, window_bounds = array<i64: 128, 128>}]} {
    %c0_i32 = arith.constant 0 : i32
    %0 = arith.cmpi eq, %arg1, %c0_i32 : i32
    %1 = arith.extui %0 : i1 to i32
    %c0_i32_0 = arith.constant 0 : i32
    %2 = arith.cmpi ne, %1, %c0_i32_0 : i32
    scf.if %2 {
      %cst_9 = arith.constant 0.000000e+00 : f32
      %16 = vector.broadcast %cst_9 : f32 to vector<128x128xf32>
      %c0_10 = arith.constant 0 : index
      %c0_11 = arith.constant 0 : index
      %17 = vector.load %arg11[%c0_10, %c0_11] : memref<128x128xf32, #tpu.memory_space<vmem>>, vector<128x128xf32>
      tpu.vector_store %arg11[%c0_10, %c0_11], %16 {strides = array<i32>} : memref<128x128xf32, #tpu.memory_space<vmem>>, vector<128x128xf32>,
    } else {
    }
    %c0 = arith.constant 0 : index
    %c0_1 = arith.constant 0 : index
    %3 = vector.load %arg2[%c0, %c0_1] : memref<128x128xi8, #tpu.memory_space<vmem>>, vector<128x128xi8>
    %4 = arith.sitofp %3 : vector<128x128xi8> to vector<128x128xbf16>
    %c128_i32 = arith.constant 128 : i32
    %5 = arith.muli %arg1, %c128_i32 : i32
    %6 = tpu.assume_multiple %5, 128 : i32
    %7 = arith.index_cast %6 : i32 to index
    %c0_2 = arith.constant 0 : index
    %8 = vector.load %arg3[%7, %c0_2] : memref<128x128xbf16, #tpu.memory_space<vmem>>, vector<128x128xbf16>
    %c0_3 = arith.constant 0 : index
    %c0_4 = arith.constant 0 : index
    %9 = vector.load %arg11[%c0_3, %c0_4] : memref<128x128xf32, #tpu.memory_space<vmem>>, vector<128x128xf32>
    %cst = arith.constant dense<0.000000e+00> : vector<128x128xf32>
    %10 = tpu.matmul %4, %8, %cst {dimension_numbers = #tpu.dot_dimension_numbers<[1], [0], [0], [1], [0, 0, 1, 1], [], []>} : vector<128x128xbf16>, vector<128x128xbf16>, vector<128x128xf32> -> vector<128x128xf32>
    %11 = arith.addf %9, %10 : vector<128x128xf32>
    %c0_5 = arith.constant 0 : index
    %c0_6 = arith.constant 0 : index
    %12 = vector.load %arg11[%c0_5, %c0_6] : memref<128x128xf32, #tpu.memory_space<vmem>>, vector<128x128xf32>
    tpu.vector_store %arg11[%c0_5, %c0_6], %11 {strides = array<i32>} : memref<128x128xf32, #tpu.memory_space<vmem>>, vector<128x128xf32>,
    %c0_i32_7 = arith.constant 0 : i32
    %13 = arith.cmpi eq, %arg1, %c0_i32_7 : i32
    %14 = arith.extui %13 : i1 to i32
    %c0_i32_8 = arith.constant 0 : i32
    %15 = arith.cmpi ne, %14, %c0_i32_8 : i32
    scf.if %15 {
      %c0_9 = arith.constant 0 : index
      %c0_10 = arith.constant 0 : index
      %16 = vector.load %arg11[%c0_9, %c0_10] : memref<128x128xf32, #tpu.memory_space<vmem>>, vector<128x128xf32>
      %17 = arith.truncf %16 : vector<128x128xf32> to vector<128x128xbf16>
      %c0_11 = arith.constant 0 : index
      %c0_12 = arith.constant 0 : index
      %18 = vector.load %arg4[%c0_11, %c0_12] : memref<128x128xbf16, #tpu.memory_space<vmem>>, vector<128x128xbf16>
      %cst_13 = arith.constant dense<0.000000e+00> : vector<128x128xf32>
      %19 = tpu.matmul %17, %18, %cst_13 {dimension_numbers = #tpu.dot_dimension_numbers<[1], [0], [0], [1], [0, 0, 1, 1], [], []>} : vector<128x128xbf16>, vector<128x128xbf16>, vector<128x128xf32> -> vector<128x128xf32>
      %c0_14 = arith.constant 0 : index
      %c0_15 = arith.constant 0 : index
      %20 = vector.load %arg5[%c0_14, %c0_15] : memref<1x128xf32, #tpu.memory_space<vmem>>, vector<1x128xf32>
      %21 = vector.broadcast %20 : vector<1x128xf32> to vector<128x128xf32>
      %22 = arith.addf %19, %21 : vector<128x128xf32>
      %cst_16 = arith.constant dense<0.000000e+00> : vector<128xf32>
      %23 = vector.multi_reduction <add>, %22, %cst_16 [1] : vector<128x128xf32> to vector<128xf32>
      %24 = vector.shape_cast %23 : vector<128xf32> to vector<128x1xf32>
      %cst_17 = arith.constant 3.125000e-02 : f32
      %25 = vector.broadcast %cst_17 : f32 to vector<128x1xf32>
      %26 = arith.mulf %24, %25 : vector<128x1xf32>
      %27 = arith.mulf %22, %22 : vector<128x128xf32>
      %cst_18 = arith.constant dense<0.000000e+00> : vector<128xf32>
      %28 = vector.multi_reduction <add>, %27, %cst_18 [1] : vector<128x128xf32> to vector<128xf32>
      %29 = vector.shape_cast %28 : vector<128xf32> to vector<128x1xf32>
      %cst_19 = arith.constant 3.125000e-02 : f32
      %30 = vector.broadcast %cst_19 : f32 to vector<128x1xf32>
      %31 = arith.mulf %29, %30 : vector<128x1xf32>
      %32 = arith.mulf %26, %26 : vector<128x1xf32>
      %33 = arith.subf %31, %32 : vector<128x1xf32>
      %34 = vector.broadcast %26 : vector<128x1xf32> to vector<128x128xf32>
      %35 = arith.subf %22, %34 : vector<128x128xf32>
      %cst_20 = arith.constant 9.99999974E-6 : f32
      %36 = vector.broadcast %cst_20 : f32 to vector<128x1xf32>
      %37 = arith.addf %33, %36 : vector<128x1xf32>
      %38 = math.rsqrt %37 : vector<128x1xf32>
      %39 = vector.broadcast %38 : vector<128x1xf32> to vector<128x128xf32>
      %40 = arith.mulf %35, %39 : vector<128x128xf32>
      %c0_21 = arith.constant 0 : index
      %c0_22 = arith.constant 0 : index
      %41 = vector.load %arg6[%c0_21, %c0_22] : memref<1x128xf32, #tpu.memory_space<vmem>>, vector<1x128xf32>
      %42 = vector.broadcast %41 : vector<1x128xf32> to vector<128x128xf32>
      %43 = arith.mulf %40, %42 : vector<128x128xf32>
      %c0_23 = arith.constant 0 : index
      %c0_24 = arith.constant 0 : index
      %44 = vector.load %arg7[%c0_23, %c0_24] : memref<1x128xf32, #tpu.memory_space<vmem>>, vector<1x128xf32>
      %45 = vector.broadcast %44 : vector<1x128xf32> to vector<128x128xf32>
      %46 = arith.addf %43, %45 : vector<128x128xf32>
      %cst_25 = arith.constant 0.000000e+00 : f32
      %47 = vector.broadcast %cst_25 : f32 to vector<128x128xf32>
      %48 = arith.maximumf %46, %47 : vector<128x128xf32>
      %49 = arith.truncf %48 : vector<128x128xf32> to vector<128x128xbf16>
      %c0_26 = arith.constant 0 : index
      %c0_27 = arith.constant 0 : index
      %50 = vector.load %arg8[%c0_26, %c0_27] : memref<128x128xbf16, #tpu.memory_space<vmem>>, vector<128x128xbf16>
      %cst_28 = arith.constant dense<0.000000e+00> : vector<128x128xf32>
      %51 = tpu.matmul %49, %50, %cst_28 {dimension_numbers = #tpu.dot_dimension_numbers<[1], [0], [0], [1], [0, 0, 1, 1], [], []>} : vector<128x128xbf16>, vector<128x128xbf16>, vector<128x128xf32> -> vector<128x128xf32>
      %c0_29 = arith.constant 0 : index
      %c0_30 = arith.constant 0 : index
      %52 = vector.load %arg9[%c0_29, %c0_30] : memref<1x128xf32, #tpu.memory_space<vmem>>, vector<1x128xf32>
      %53 = vector.broadcast %52 : vector<1x128xf32> to vector<128x128xf32>
      %54 = arith.addf %51, %53 : vector<128x128xf32>
      %c0_31 = arith.constant 0 : index
      %c0_32 = arith.constant 0 : index
      %55 = vector.load %arg10[%c0_31, %c0_32] : memref<128x128xf32, #tpu.memory_space<vmem>>, vector<128x128xf32>
      tpu.vector_store %arg10[%c0_31, %c0_32], %54 {strides = array<i32>} : memref<128x128xf32, #tpu.memory_space<vmem>>, vector<128x128xf32>,
    } else {
    }
    return
  }
  func.func @transform_0(%arg0: i32, %arg1: i32) -> (i32, i32) {
    %c0_i32 = arith.constant 0 : i32
    return %arg0, %arg1 : i32, i32
  }
  func.func @transform_1(%arg0: i32, %arg1: i32) -> (i32, i32) {
    %c0_i32 = arith.constant 0 : i32
    %c0_i32_0 = arith.constant 0 : i32
    %c0_i32_1 = arith.constant 0 : i32
    return %c0_i32, %c0_i32_0 : i32, i32
  }
  func.func @transform_2(%arg0: i32, %arg1: i32) -> (i32, i32) {
    %c0_i32 = arith.constant 0 : i32
    %c0_i32_0 = arith.constant 0 : i32
    %c0_i32_1 = arith.constant 0 : i32
    return %c0_i32, %c0_i32_0 : i32, i32
  }
  func.func @transform_3(%arg0: i32, %arg1: i32) -> (i32, i32) {
    %c0_i32 = arith.constant 0 : i32
    %c0_i32_0 = arith.constant 0 : i32
    %c0_i32_1 = arith.constant 0 : i32
    return %c0_i32, %c0_i32_0 : i32, i32
  }
  func.func @transform_4(%arg0: i32, %arg1: i32) -> (i32, i32) {
    %c0_i32 = arith.constant 0 : i32
    %c0_i32_0 = arith.constant 0 : i32
    %c0_i32_1 = arith.constant 0 : i32
    return %c0_i32, %c0_i32_0 : i32, i32
  }
  func.func @transform_5(%arg0: i32, %arg1: i32) -> (i32, i32) {
    %c0_i32 = arith.constant 0 : i32
    %c0_i32_0 = arith.constant 0 : i32
    %c0_i32_1 = arith.constant 0 : i32
    return %c0_i32, %c0_i32_0 : i32, i32
  }
  func.func @transform_6(%arg0: i32, %arg1: i32) -> (i32, i32) {
    %c0_i32 = arith.constant 0 : i32
    %c0_i32_0 = arith.constant 0 : i32
    %c0_i32_1 = arith.constant 0 : i32
    return %c0_i32, %c0_i32_0 : i32, i32
  }
  func.func @transform_7(%arg0: i32, %arg1: i32) -> (i32, i32) {
    %c0_i32 = arith.constant 0 : i32
    %c0_i32_0 = arith.constant 0 : i32
    %c0_i32_1 = arith.constant 0 : i32
    return %c0_i32, %c0_i32_0 : i32, i32
  }
  func.func @transform_8(%arg0: i32, %arg1: i32) -> (i32, i32) {
    %c0_i32 = arith.constant 0 : i32
    %c0_i32_0 = arith.constant 0 : i32
    return %arg0, %c0_i32 : i32, i32
  }
}

</mosaic_0001>

<bundles_post_ra>
// kernel: agfnn_gin_forward.5
= control target key start
LH: loop header
LB: loop body
LE: loop exit
PB: predicated region body
PF: predicated region fallthrough
CT: control target
= control target key end

     0   :  { %s1587_s1 = inlined_call_operand.vmem [shape: bf16[128,128], index: 1, kind: input, shape index: {}]   ;;  %s1588_s0 = inlined_call_operand.vmem [shape: s8[128,128], index: 0, kind: input, shape index: {}]   ;;  %s1589_s2 = inlined_call_operand.vmem [shape: bf16[128,128], index: 2, kind: input, shape index: {}]   ;;  %s1590_s3 = inlined_call_operand.vmem [shape: f32[1,128], index: 3, kind: input, shape index: {}]   ;;  %s1591_s6 = inlined_call_operand.vmem [shape: bf16[128,128], index: 6, kind: input, shape index: {}]   ;;  %s1592_s4 = inlined_call_operand.vmem [shape: f32[1,128], index: 4, kind: input, shape index: {}]   ;;  %s1593_s5 = inlined_call_operand.vmem [shape: f32[1,128], index: 5, kind: input, shape index: {}]   ;;  %s1594_s7 = inlined_call_operand.vmem [shape: f32[1,128], index: 7, kind: input, shape index: {}]   ;;  %s1595_s8 = inlined_call_operand.vmem [shape: f32[128,128], index: 8, kind: output, shape index: {}]  }
   0x1   :  { %v1127_v0 = vld [vmem:[%s1587_s1 + $0x38] sm:$0xff]   ;;  %v1128_v1 = vld [vmem:[%s1587_s1 + $0x30] sm:$0xff]   ;;  %v1129_v2 = vld [vmem:[%s1587_s1 + $0x28] sm:$0xff]  }
   0x2   :  { %1015 = vmatprep.subr.bf16.mxu0 %v1127_v0  ;;  %v1130_v3 = vld [vmem:[%s1587_s1 + $0x20] sm:$0xff]   ;;  %v1135_v6 = vld [vmem:[%s1589_s2 + $0x38] sm:$0xff]   ;;  %v1136_v7 = vld [vmem:[%s1589_s2 + $0x30] sm:$0xff]  }
   0x3   :  { %1016 = vmatpush3.bf16.msra.mxu0 %v1127_v0  ;;  %v50_v4 = vld [vmem:[%s1588_s0] sm:$0xff]  ;;  %v1131_v8 = vld [vmem:[%s1587_s1 + $0x18] sm:$0xff]   ;;  %1047 = vmatprep.subr.bf16.mxu1 %v1135_v6  ;;  %v1137_v9 = vld [vmem:[%s1589_s2 + $0x28] sm:$0xff]  }
   0x4   :  { %1017 = vmatprep.subr.bf16.mxu0 %v1128_v1  ;;  %v54_v5 = vunpack.c.l.s8.bf16 %v50_v4  ;;  %1048 = vmatpush3.bf16.msra.mxu1 %v1135_v6  ;;  %v1132_v10 = vld [vmem:[%s1587_s1 + $0x10] sm:$0xff]   ;;  %v1138_v11 = vld [vmem:[%s1589_s2 + $0x20] sm:$0xff]   ;;  %v1133_v12 = vld [vmem:[%s1587_s1 + $0x8] sm:$0xff]   ;;  %v55_v17 = vunpack.c.h.s8.bf16 %v50_v4 }
   0x5   :  { %1049 = vmatprep.subr.bf16.mxu1 %v1136_v7  ;;  %v1139_v13 = vld [vmem:[%s1589_s2 + $0x18] sm:$0xff]   ;;  %v1134_v14 = vld [vmem:[%s1587_s1] sm:$0xff]   ;;  %v1140_v15 = vld [vmem:[%s1589_s2 + $0x10] sm:$0xff]  }
   0x6   :  { %1031 = vmatprep.mubr.bf16.mxu0 %v54_v5  ;;  %v51_v16 = vld [vmem:[%s1588_s0 + $0x8] sm:$0xff]  ;;  %v52_v19 = vld [vmem:[%s1588_s0 + $0x10] sm:$0xff]  ;;  %v53_v22 = vld [vmem:[%s1588_s0 + $0x18] sm:$0xff] }
   0x7   :  { %1018 = vmatpush3.bf16.msra.mxu0 %v1128_v1  ;;  %v56_v18 = vunpack.c.l.s8.bf16 %v51_v16  ;;  %v57_v20 = vunpack.c.h.s8.bf16 %v51_v16  ;;  %v58_v21 = vunpack.c.l.s8.bf16 %v52_v19  ;;  %v59_v23 = vunpack.c.h.s8.bf16 %v52_v19  ;;  %v1141_v26 = vld [vmem:[%s1589_s2 + $0x8] sm:$0xff]   ;;  %v1142_v27 = vld [vmem:[%s1589_s2] sm:$0xff]  }
   0x8   :  { %1019 = vmatprep.subr.bf16.mxu0 %v1129_v2  ;;  %1050 = vmatpush3.bf16.msra.mxu1 %v1136_v7  ;;  %v60_v24 = vunpack.c.l.s8.bf16 %v53_v22  ;;  %v61_v25 = vunpack.c.h.s8.bf16 %v53_v22  ;;  %v1291_v52 = vld [vmem:[%s1590_s3] ss:$0 sm:$0xff] }
   0x9   :  { %1051 = vmatprep.subr.bf16.mxu1 %v1137_v9 }
   0xb   :  { %1020 = vmatpush3.bf16.msra.mxu0 %v1129_v2 }
   0xc   :  { %1021 = vmatprep.subr.bf16.mxu0 %v1130_v3  ;;  %1052 = vmatpush3.bf16.msra.mxu1 %v1137_v9 }
   0xd   :  { %1053 = vmatprep.subr.bf16.mxu1 %v1138_v11 }
   0xf   :  { %1022 = vmatpush3.bf16.msra.mxu0 %v1130_v3 }
  0x10   :  { %1023 = vmatprep.subr.bf16.mxu0 %v1131_v8  ;;  %1054 = vmatpush3.bf16.msra.mxu1 %v1138_v11 }
  0x11   :  { %1055 = vmatprep.subr.bf16.mxu1 %v1139_v13 }
  0x13   :  { %1024 = vmatpush3.bf16.msra.mxu0 %v1131_v8 }
  0x14   :  { %1025 = vmatprep.subr.bf16.mxu0 %v1132_v10  ;;  %1056 = vmatpush3.bf16.msra.mxu1 %v1139_v13  ;;  %v1143_v13 = vld [vmem:[%s1591_s6 + $0x38] sm:$0xff]  }
  0x15   :  { %1057 = vmatprep.subr.bf16.mxu1 %v1140_v15 }
  0x17   :  { %1026 = vmatpush3.bf16.msra.mxu0 %v1132_v10 }
  0x18   :  { %1027 = vmatprep.subr.bf16.mxu0 %v1133_v12  ;;  %1058 = vmatpush3.bf16.msra.mxu1 %v1140_v15 }
  0x19   :  { %1059 = vmatprep.subr.bf16.mxu1 %v1141_v26 }
  0x1b   :  { %1028 = vmatpush3.bf16.msra.mxu0 %v1133_v12 }
  0x1c   :  { %1029 = vmatprep.subr.bf16.mxu0 %v1134_v14  ;;  %1060 = vmatpush3.bf16.msra.mxu1 %v1141_v26 }
  0x1d   :  { %1061 = vmatprep.subr.bf16.mxu1 %v1142_v27 }
  0x1f   :  { %1030 = vmatpush3.bf16.msra.mxu0 %v1134_v14 }
  0x20   :  { %1062 = vmatpush3.bf16.msra.mxu1 %v1142_v27  ;;  %1079 = vmatprep.subr.bf16.mxu0 %v1143_v13 }
  0x21   :  { %1111 = vmatprep.subr.bf16.mxu1 %v1143_v13 }
  0x22   :  { %1032 = vmatmul.mubr.bf16.vlgmr.msra.gmra.mxu0 %v55_v17  ;;  %v1144_v17 = vld [vmem:[%s1591_s6 + $0x30] sm:$0xff]  }
  0x23   :  { %1035 = vmatprep.mubr.bf16.mxu0 %v56_v18  ;;  %1080 = vmatpush3.bf16.msra.mxu0 %v1143_v13 }
  0x24   :  { %1081 = vmatprep.subr.bf16.mxu0 %v1144_v17 }
  0x27   :  { %1082 = vmatpush3.bf16.msra.mxu0 %v1144_v17 }
  0x2a   :  { %1036 = vmatmul.mubr.bf16.gmra.mxu0 %v57_v20 }
  0x2b   :  { %1039 = vmatprep.mubr.bf16.mxu0 %v58_v21  ;;  %v1145_v21 = vld [vmem:[%s1591_s6 + $0x28] sm:$0xff]  }
  0x2c   :  { %1083 = vmatprep.subr.bf16.mxu0 %v1145_v21 }
  0x2d   :  { %1084 = vmatpush3.bf16.msra.mxu0 %v1145_v21 }
  0x32   :  { %1040 = vmatmul.mubr.bf16.gmra.mxu0 %v59_v23 }
  0x33   :  { %1043 = vmatprep.mubr.bf16.mxu0 %v60_v24 }
  0x3a   :  { %1044 = vmatmul.mubr.bf16.gmra.mxu0 %v61_v25  ;;  %v1146_v25 = vld [vmem:[%s1591_s6 + $0x20] sm:$0xff]  }
  0x3b   :  { %1085 = vmatprep.subr.bf16.mxu0 %v1146_v25 }
  0x3c   :  { %1086 = vmatpush3.bf16.msra.mxu0 %v1146_v25 }
  0xe2   :  { %v1033_v28 = vpop.f32.mrf.mxu0 }
  0xe4   :  { %v181_v29 = vpop.f32.mrf.mxu0 }
  0xe6   :  { %v1034_v30 = vpop.f32.mrf.mxu0 }
  0xe7   :  { %v296_v33 = vpack.c.bf16 %v1034_v30, %v1033_v28 }
  0xe8   :  { %v184_v31 = vpop.f32.mrf.mxu0 }
  0xe9   :  { %v295_v32 = vpack.c.bf16 %v184_v31, %v181_v29  ;;  %v1147_v29 = vld [vmem:[%s1591_s6 + $0x18] sm:$0xff]  }
  0xea   :  { %v1037_v34 = vpop.f32.mrf.mxu0  ;;  %1087 = vmatprep.subr.bf16.mxu0 %v1147_v29 }
  0xeb   :  { %1063 = vmatprep.mubr.bf16.mxu1 %v295_v32  ;;  %1088 = vmatpush3.bf16.msra.mxu0 %v1147_v29 }
  0xec   :  { %v197_v35 = vpop.f32.mrf.mxu0  ;;  %1064 = vmatmul.mubr.bf16.vlgmr.msra.gmra.mxu1 %v296_v33  ;;  %v1148_v33 = vld [vmem:[%s1591_s6 + $0x10] sm:$0xff]  }
  0xed   :  { %1119 = vmatpush3.bf16.msra.mxu1 %v1143_v13  ;;  %1089 = vmatprep.subr.bf16.mxu0 %v1148_v33 }
  0xee   :  { %v1038_v36 = vpop.f32.mrf.mxu0  ;;  %1112 = vmatprep.subr.bf16.mxu1 %v1144_v17 }
  0xef   :  { %v298_v39 = vpack.c.bf16 %v1038_v36, %v1037_v34  ;;  %1090 = vmatpush3.bf16.msra.mxu0 %v1148_v33 }
  0xf0   :  { %v200_v37 = vpop.f32.mrf.mxu0 }
  0xf1   :  { %v297_v38 = vpack.c.bf16 %v200_v37, %v197_v35  ;;  %1120 = vmatpush3.bf16.msra.mxu1 %v1144_v17  ;;  %v1149_v37 = vld [vmem:[%s1591_s6 + $0x8] sm:$0xff]  }
  0xf2   :  { %v1041_v40 = vpop.f32.mrf.mxu0  ;;  %1113 = vmatprep.subr.bf16.mxu1 %v1145_v21  ;;  %1091 = vmatprep.subr.bf16.mxu0 %v1149_v37 }
  0xf3   :  { %1067 = vmatprep.mubr.bf16.mxu1 %v297_v38  ;;  %1092 = vmatpush3.bf16.msra.mxu0 %v1149_v37 }
  0xf4   :  { %1068 = vmatmul.mubr.bf16.gmra.mxu1 %v298_v39  ;;  %v213_v41 = vpop.f32.mrf.mxu0 }
  0xf5   :  { %1121 = vmatpush3.bf16.msra.mxu1 %v1145_v21 }
  0xf6   :  { %v1042_v42 = vpop.f32.mrf.mxu0  ;;  %1114 = vmatprep.subr.bf16.mxu1 %v1146_v25 }
  0xf7   :  { %v300_v43 = vpack.c.bf16 %v1042_v42, %v1041_v40 }
  0xf8   :  { %v216_v44 = vpop.f32.mrf.mxu0 }
  0xf9   :  { %v299_v45 = vpack.c.bf16 %v216_v44, %v213_v41  ;;  %1122 = vmatpush3.bf16.msra.mxu1 %v1146_v25  ;;  %v1150_v41 = vld [vmem:[%s1591_s6] sm:$0xff]  }
  0xfa   :  { %v1045_v46 = vpop.f32.mrf.mxu0  ;;  %1115 = vmatprep.subr.bf16.mxu1 %v1147_v29  ;;  %1093 = vmatprep.subr.bf16.mxu0 %v1150_v41 }
  0xfb   :  { %1071 = vmatprep.mubr.bf16.mxu1 %v299_v45  ;;  %1094 = vmatpush3.bf16.msra.mxu0 %v1150_v41 }
  0xfc   :  { %1072 = vmatmul.mubr.bf16.gmra.mxu1 %v300_v43  ;;  %v229_v47 = vpop.f32.mrf.mxu0 }
  0xfd   :  { %1123 = vmatpush3.bf16.msra.mxu1 %v1147_v29 }
  0xfe   :  { %v1046_v48 = vpop.f32.mrf.mxu0  ;;  %1116 = vmatprep.subr.bf16.mxu1 %v1148_v33 }
  0xff   :  { %v302_v49 = vpack.c.bf16 %v1046_v48, %v1045_v46 }
 0x100   :  { %v232_v50 = vpop.f32.mrf.mxu0 }
 0x101   :  { %v301_v51 = vpack.c.bf16 %v232_v50, %v229_v47  ;;  %1124 = vmatpush3.bf16.msra.mxu1 %v1148_v33 }
 0x102   :  { %1117 = vmatprep.subr.bf16.mxu1 %v1149_v37 }
 0x103   :  { %1075 = vmatprep.mubr.bf16.mxu1 %v301_v51 }
 0x104   :  { %1076 = vmatmul.mubr.bf16.gmra.mxu1 %v302_v49 }
 0x105   :  { %1125 = vmatpush3.bf16.msra.mxu1 %v1149_v37 }
 0x106   :  { %1118 = vmatprep.subr.bf16.mxu1 %v1150_v41 }
 0x109   :  { %1126 = vmatpush3.bf16.msra.mxu1 %v1150_v41 }
 0x1ac   :  { %v1065_v53 = vpop.f32.mrf.mxu1 }
 0x1ad   :  { %v1294_v54 = vadd.f32 %v1065_v53, %v1291_v52 }
 0x1ae   :  { %v408_v55 = vpop.f32.mrf.mxu1 }
 0x1af   :  { %475 = vadd.xlane.f32.xlu0 %v1294_v54  ;;  %v1298_v57 = vadd.f32 %v1291_v52, %v408_v55  ;;  %v521_v63 = vmul.f32 %v1294_v54, %v1294_v54 }
 0x1b0   :  { %v1066_v56 = vpop.f32.mrf.mxu1 }
 0x1b1   :  { %v1301_v58 = vadd.f32 %v1066_v56, %v1291_v52  ;;  %v519_v2 = vmul.f32 %v1298_v57, %v1298_v57 }
 0x1b2   :  { %v411_v59 = vpop.f32.mrf.mxu1 }
 0x1b3   :  { %477 = vadd.xlane.f32.xlu1 %v1301_v58  ;;  %471 = vadd.xlane.f32.xlu0 %v1298_v57  ;;  %v1306_v61 = vadd.f32 %v1291_v52, %v411_v59  ;;  %v522_v62 = vmul.f32 %v1301_v58, %v1301_v58 }
 0x1b4   :  { %v1069_v60 = vpop.f32.mrf.mxu1 }
 0x1b5   :  { %v520_v1 = vmul.f32 %v1306_v61, %v1306_v61  ;;  %v1322_v6 = vadd.f32 %v1069_v60, %v1291_v52 }
 0x1b6   :  { %v424_v0 = vpop.f32.mrf.mxu1 }
 0x1b7   :  { %541 = vadd.xlane.f32.xlu1 %v522_v62  ;;  %539 = vadd.xlane.f32.xlu0 %v521_v63  ;;  %v1330_v8 = vadd.f32 %v1291_v52, %v424_v0  ;;  %v525_v12 = vmul.f32 %v1322_v6, %v1322_v6 }
 0x1b8   :  { %v1070_v3 = vpop.f32.mrf.mxu1 }
 0x1b9   :  { %v1317_v4 = vadd.f32 %v1070_v3, %v1291_v52  ;;  %v523_v16 = vmul.f32 %v1330_v8, %v1330_v8 }
 0x1ba   :  { %v427_v5 = vpop.f32.mrf.mxu1 }
 0x1bb   :  { %537 = vadd.xlane.f32.xlu1 %v520_v1  ;;  %535 = vadd.xlane.f32.xlu0 %v519_v2  ;;  %v1325_v7 = vadd.f32 %v1291_v52, %v427_v5  ;;  %v526_v9 = vmul.f32 %v1317_v4, %v1317_v4 }
 0x1bc   :  { %v1073_v10 = vpop.f32.mrf.mxu1 }
 0x1bd   :  { %v524_v11 = vmul.f32 %v1325_v7, %v1325_v7  ;;  %v1352_v19 = vadd.f32 %v1073_v10, %v1291_v52 }
 0x1be   :  { %v440_v14 = vpop.f32.mrf.mxu1 }
 0x1bf   :  { %473 = vadd.xlane.f32.xlu0 %v1306_v61  ;;  %485 = vadd.xlane.f32.xlu1 %v1317_v4  ;;  %v1343_v15 = vadd.f32 %v1291_v52, %v440_v14  ;;  %v529_v24 = vmul.f32 %v1352_v19, %v1352_v19 }
 0x1c0   :  { %v1074_v18 = vpop.f32.mrf.mxu1 }
 0x1c1   :  { %v1355_v20 = vadd.f32 %v1074_v18, %v1291_v52  ;;  %v527_v28 = vmul.f32 %v1343_v15, %v1343_v15 }
 0x1c2   :  { %v443_v22 = vpop.f32.mrf.mxu1 }
 0x1c3   :  { %483 = vadd.xlane.f32.xlu0 %v1322_v6  ;;  %481 = vadd.xlane.f32.xlu1 %v1325_v7  ;;  %v1363_v23 = vadd.f32 %v1291_v52, %v443_v22  ;;  %v530_v27 = vmul.f32 %v1355_v20, %v1355_v20 }
 0x1c4   :  { %v1077_v26 = vpop.f32.mrf.mxu1 }
 0x1c5   :  { %v1379_v31 = vadd.f32 %v1077_v26, %v1291_v52  ;;  %v528_v32 = vmul.f32 %v1363_v23, %v1363_v23 }
 0x1c6   :  { %v456_v30 = vpop.f32.mrf.mxu1 }
 0x1c7   :  { %549 = vadd.xlane.f32.xlu1 %v526_v9  ;;  %479 = vadd.xlane.f32.xlu0 %v1330_v8  ;;  %v1388_v35 = vadd.f32 %v1291_v52, %v456_v30  ;;  %v533_v43 = vmul.f32 %v1379_v31, %v1379_v31 }
 0x1c8   :  { %v1078_v34 = vpop.f32.mrf.mxu1 }
 0x1c9   :  { %v1391_v36 = vadd.f32 %v1078_v34, %v1291_v52  ;;  %v531_v40 = vmul.f32 %v1388_v35, %v1388_v35 }
 0x1ca   :  { %v459_v38 = vpop.f32.mrf.mxu1 }
 0x1cb   :  { %545 = vadd.xlane.f32.xlu1 %v524_v11  ;;  %547 = vadd.xlane.f32.xlu0 %v525_v12  ;;  %v1399_v39 = vadd.f32 %v1291_v52, %v459_v38  ;;  %v534_v44 = vmul.f32 %v1391_v36, %v1391_v36 }
 0x1cd   :  { %v532_v42 = vmul.f32 %v1399_v39, %v1399_v39 }
 0x1cf   :  { %543 = vadd.xlane.f32.xlu0 %v523_v16  ;;  %487 = vadd.xlane.f32.xlu1 %v1343_v15 }
 0x1d3   :  { %491 = vadd.xlane.f32.xlu0 %v1352_v19  ;;  %493 = vadd.xlane.f32.xlu1 %v1355_v20 }
 0x1d7   :  { %555 = vadd.xlane.f32.xlu0 %v529_v24  ;;  %489 = vadd.xlane.f32.xlu1 %v1363_v23 }
 0x1db   :  { %557 = vadd.xlane.f32.xlu1 %v530_v27  ;;  %551 = vadd.xlane.f32.xlu0 %v527_v28 }
 0x1df   :  { %553 = vadd.xlane.f32.xlu1 %v528_v32  ;;  %499 = vadd.xlane.f32.xlu0 %v1379_v31 }
 0x1e3   :  { %501 = vadd.xlane.f32.xlu1 %v1391_v36  ;;  %495 = vadd.xlane.f32.xlu0 %v1388_v35 }
 0x1e7   :  { %497 = vadd.xlane.f32.xlu1 %v1399_v39  ;;  %559 = vadd.xlane.f32.xlu0 %v531_v40 }
 0x1eb   :  { %561 = vadd.xlane.f32.xlu1 %v532_v42  ;;  %563 = vadd.xlane.f32.xlu0 %v533_v43 }
 0x1ef   :  { %565 = vadd.xlane.f32.xlu1 %v534_v44 }
 0x238   :  { %v476_v45 = vpop.xlane.xlu0 %475 }
 0x239   :  { %v505_v46 = vmul.f32 0.03125, %v476_v45 }
 0x23b   :  { %v585_v50 = vmul.f32 %v505_v46, %v505_v46  ;;  %v617_v34 = vsub.f32 %v1294_v54, %v505_v46 }
 0x23c   :  { %v478_v47 = vpop.xlane.xlu1 %477  ;;  %v472_v48 = vpop.xlane.xlu0 %471 }
 0x23d   :  { %v506_v49 = vmul.f32 0.03125, %v478_v47  ;;  %v1413_v55 = vmul.f32 0.03125, %v472_v48 }
 0x23f   :  { %v586_v53 = vmul.f32 %v506_v49, %v506_v49  ;;  %v583_v1 = vmul.f32 %v1413_v55, %v1413_v55  ;;  %v618_v48 = vsub.f32 %v1301_v58, %v506_v49  ;;  %v615_v46 = vsub.f32 %v1298_v57, %v1413_v55 }
 0x240   :  { %v542_v51 = vpop.xlane.xlu1 %541  ;;  %v540_v52 = vpop.xlane.xlu0 %539 }
 0x241   :  { %v570_v56 = vmul.f32 0.03125, %v542_v51  ;;  %v569_v59 = vmul.f32 0.03125, %v540_v52 }
 0x243   :  { %v602_v60 = vsub.f32 %v570_v56, %v586_v53  ;;  %v601_v62 = vsub.f32 %v569_v59, %v585_v50  ;;  %v1438_v56 = vld [vmem:[%s1592_s4] ss:$0 sm:$0xff] }
 0x244   :  { %v538_v63 = vpop.xlane.xlu1 %537  ;;  %v536_v0 = vpop.xlane.xlu0 %535 }
 0x245   :  { %v634_v2 = vadd.f32 1e-05, %v602_v60  ;;  %v633_v3 = vadd.f32 1e-05, %v601_v62  ;;  %v567_v5 = vmul.f32 0.03125, %v536_v0  ;;  %v568_v14 = vmul.f32 0.03125, %v538_v63 }
 0x247   :  { %1151 = vrsqrt.f32 %v634_v2  ;;  %v599_v9 = vsub.f32 %v567_v5, %v583_v1  ;;  %v1447_v5 = vld [vmem:[%s1593_s5] ss:$0 sm:$0xff] }
 0x248   :  { %1153 = vrsqrt.f32 %v633_v3  ;;  %v474_v10 = vpop.xlane.xlu0 %473  ;;  %v486_v11 = vpop.xlane.xlu1 %485 }
 0x249   :  { %v631_v12 = vadd.f32 1e-05, %v599_v9  ;;  %v504_v13 = vmul.f32 0.03125, %v474_v10  ;;  %v1417_v22 = vmul.f32 0.03125, %v486_v11 }
 0x24b   :  { %1155 = vrsqrt.f32 %v631_v12  ;;  %v584_v16 = vmul.f32 %v504_v13, %v504_v13  ;;  %v590_v29 = vmul.f32 %v1417_v22, %v1417_v22  ;;  %v616_v10 = vsub.f32 %v1306_v61, %v504_v13 }
 0x24c   :  { %v484_v17 = vpop.xlane.xlu0 %483  ;;  %v482_v18 = vpop.xlane.xlu1 %481 }
 0x24d   :  { %v600_v21 = vsub.f32 %v568_v14, %v584_v16  ;;  %v1419_v25 = vmul.f32 0.03125, %v484_v17  ;;  %v1421_v26 = vmul.f32 0.03125, %v482_v18 }
 0x24f   :  { %v632_v24 = vadd.f32 1e-05, %v600_v21  ;;  %v589_v37 = vmul.f32 %v1419_v25, %v1419_v25  ;;  %v588_v38 = vmul.f32 %v1421_v26, %v1421_v26 }
 0x250   :  { %v550_v27 = vpop.xlane.xlu1 %549  ;;  %v480_v28 = vpop.xlane.xlu0 %479 }
 0x251   :  { %1157 = vrsqrt.f32 %v632_v24  ;;  %v574_v30 = vmul.f32 0.03125, %v550_v27  ;;  %v1430_v44 = vmul.f32 0.03125, %v480_v28 }
 0x253   :  { %v606_v32 = vsub.f32 %v574_v30, %v590_v29  ;;  %v587_v62 = vmul.f32 %v1430_v44, %v1430_v44 }
 0x254   :  { %v1152_v33 = vpop.eup %1151  ;;  %v546_v40 = vpop.xlane.xlu1 %545 }
 0x255   :  { %v548_v41 = vpop.xlane.xlu0 %547  ;;  %v1154_v42 = vpop.eup %1153  ;;  %v638_v43 = vadd.f32 1e-05, %v606_v32  ;;  %v572_v45 = vmul.f32 0.03125, %v546_v40  ;;  %v666_v53 = vmul.f32 %v1152_v33, %v618_v48 }
 0x256   :  { %v573_v47 = vmul.f32 0.03125, %v548_v41  ;;  %v665_v50 = vmul.f32 %v1154_v42, %v617_v34 }
 0x257   :  { %v604_v51 = vsub.f32 %v572_v45, %v588_v38  ;;  %1159 = vrsqrt.f32 %v638_v43  ;;  %v689_v9 = vmul.f32 %v1438_v56, %v666_v53 }
 0x258   :  { %v605_v52 = vsub.f32 %v573_v47, %v589_v37  ;;  %v1156_v54 = vpop.eup %1155  ;;  %v488_v60 = vpop.xlane.xlu1 %487  ;;  %v688_v57 = vmul.f32 %v1438_v56, %v665_v50 }
 0x259   :  { %v544_v59 = vpop.xlane.xlu0 %543  ;;  %v636_v58 = vadd.f32 1e-05, %v604_v51  ;;  %v663_v0 = vmul.f32 %v1156_v54, %v615_v46  ;;  %v1453_v17 = vmul.f32 0.03125, %v488_v60  ;;  %v712_v29 = vadd.f32 %v1447_v5, %v689_v9 }
 0x25a   :  { %v637_v49 = vadd.f32 1e-05, %v605_v52  ;;  %v571_v63 = vmul.f32 0.03125, %v544_v59  ;;  %v711_v18 = vadd.f32 %v1447_v5, %v688_v57  ;;  %v622_v54 = vsub.f32 %v1317_v4, %v1417_v22 }
 0x25b   :  { %1161 = vrsqrt.f32 %v636_v58  ;;  %v686_v3 = vmul.f32 %v1438_v56, %v663_v0  ;;  %v591_v32 = vmul.f32 %v1453_v17, %v1453_v17  ;;  %v728_v45 = vmax.f32 %v712_v29, 0.0 }
 0x25c   :  { %v603_v1 = vsub.f32 %v571_v63, %v587_v62  ;;  %1163 = vrsqrt.f32 %v637_v49  ;;  %v494_v2 = vpop.xlane.xlu1 %493  ;;  %v727_v37 = vmax.f32 %v711_v18, 0.0  ;;  %v621_v46 = vsub.f32 %v1322_v6, %v1419_v25 }
 0x25d   :  { %v492_v55 = vpop.xlane.xlu0 %491  ;;  %v1456_v21 = vmul.f32 0.03125, %v494_v2  ;;  %v709_v28 = vadd.f32 %v1447_v5, %v686_v3  ;;  %v620_v58 = vsub.f32 %v1325_v7, %v1421_v26  ;;  %v619_v3 = vsub.f32 %v1330_v8, %v1430_v44 }
 0x25e   :  { %v635_v11 = vadd.f32 1e-05, %v603_v1  ;;  %v1451_v12 = vmul.f32 0.03125, %v492_v55  ;;  %v1158_v14 = vpop.eup %1157  ;;  %v742_v0 = vpack.c.bf16 %v728_v45, %v727_v37 }
 0x25f   :  { %v664_v16 = vmul.f32 %v1158_v14, %v616_v10  ;;  %v594_v38 = vmul.f32 %v1456_v21, %v1456_v21  ;;  %v725_v43 = vmax.f32 %v709_v28, 0.0 }
 0x260   :  { %1165 = vrsqrt.f32 %v635_v11  ;;  %v490_v27 = vpop.xlane.xlu1 %489  ;;  %v593_v13 = vmul.f32 %v1451_v12, %v1451_v12 }
 0x261   :  { %v556_v24 = vpop.xlane.xlu0 %555  ;;  %v687_v61 = vmul.f32 %v1438_v56, %v664_v16  ;;  %v1468_v40 = vmul.f32 0.03125, %v490_v27 }
 0x262   :  { %v577_v30 = vmul.f32 0.03125, %v556_v24 }
 0x263   :  { %v710_v34 = vadd.f32 %v1447_v5, %v687_v61  ;;  %v592_v55 = vmul.f32 %v1468_v40, %v1468_v40 }
 0x264   :  { %v609_v33 = vsub.f32 %v577_v30, %v593_v13  ;;  %v558_v41 = vpop.xlane.xlu1 %557  ;;  %v1160_v47 = vpop.eup %1159 }
 0x265   :  { %v552_v42 = vpop.xlane.xlu0 %551  ;;  %v578_v50 = vmul.f32 0.03125, %v558_v41  ;;  %v726_v52 = vmax.f32 %v710_v34, 0.0  ;;  %v670_v1 = vmul.f32 %v1160_v47, %v622_v54 }
 0x266   :  { %v641_v48 = vadd.f32 1e-05, %v609_v33  ;;  %v575_v51 = vmul.f32 0.03125, %v552_v42 }
 0x267   :  { %v610_v53 = vsub.f32 %v578_v50, %v594_v38  ;;  %v741_v60 = vpack.c.bf16 %v726_v52, %v725_v43  ;;  %v693_v16 = vmul.f32 %v1438_v56, %v670_v1 }
 0x268   :  { %v607_v59 = vsub.f32 %v575_v51, %v591_v32  ;;  %v1162_v62 = vpop.eup %1161  ;;  %1167 = vrsqrt.f32 %v641_v48  ;;  %v554_v49 = vpop.xlane.xlu1 %553 }
 0x269   :  { %v500_v63 = vpop.xlane.xlu0 %499  ;;  %v1164_v57 = vpop.eup %1163  ;;  %v642_v4 = vadd.f32 1e-05, %v610_v53  ;;  %v576_v2 = vmul.f32 0.03125, %v554_v49  ;;  %1095 = vmatprep.mubr.bf16.mxu0 %v741_v60  ;;  %v668_v6 = vmul.f32 %v1162_v62, %v620_v58  ;;  %v716_v30 = vadd.f32 %v1447_v5, %v693_v16 }
 0x26a   :  { %v639_v22 = vadd.f32 1e-05, %v607_v59  ;;  %1096 = vmatmul.mubr.bf16.vlgmr.msra.gmra.mxu0 %v742_v0  ;;  %v669_v25 = vmul.f32 %v1164_v57, %v621_v46  ;;  %v1485_v28 = vmul.f32 0.03125, %v500_v63  ;;  %v625_v60 = vsub.f32 %v1352_v19, %v1451_v12 }
 0x26b   :  { %1169 = vrsqrt.f32 %v642_v4  ;;  %v608_v7 = vsub.f32 %v576_v2, %v592_v55  ;;  %v691_v11 = vmul.f32 %v1438_v56, %v668_v6  ;;  %v732_v51 = vmax.f32 %v716_v30, 0.0 }
 0x26c   :  { %1171 = vrsqrt.f32 %v639_v22  ;;  %v502_v9 = vpop.xlane.xlu1 %501  ;;  %v692_v14 = vmul.f32 %v1438_v56, %v669_v25  ;;  %v597_v38 = vmul.f32 %v1485_v28, %v1485_v28  ;;  %v626_v62 = vsub.f32 %v1355_v20, %v1456_v21 }
 0x26d   :  { %v1166_v26 = vpop.eup %1165  ;;  %v496_v10 = vpop.xlane.xlu0 %495  ;;  %v640_v18 = vadd.f32 1e-05, %v608_v7  ;;  %v714_v13 = vadd.f32 %v1447_v5, %v691_v11  ;;  %v1498_v43 = vmul.f32 0.03125, %v502_v9  ;;  %v623_v57 = vsub.f32 %v1343_v15, %v1453_v17 }
 0x26e   :  { %v1483_v24 = vmul.f32 0.03125, %v496_v10  ;;  %v667_v27 = vmul.f32 %v1166_v26, %v619_v3  ;;  %v715_v8 = vadd.f32 %v1447_v5, %v692_v14  ;;  %v624_v25 = vsub.f32 %v1363_v23, %v1468_v40 }
 0x26f   :  { %1173 = vrsqrt.f32 %v640_v18  ;;  %v730_v50 = vmax.f32 %v714_v13, 0.0  ;;  %v598_v4 = vmul.f32 %v1498_v43, %v1498_v43 }
 0x270   :  { %v498_v44 = vpop.xlane.xlu1 %497  ;;  %v690_v61 = vmul.f32 %v1438_v56, %v667_v27  ;;  %v595_v32 = vmul.f32 %v1483_v24, %v1483_v24  ;;  %v731_v42 = vmax.f32 %v715_v8, 0.0  ;;  %v627_v27 = vsub.f32 %v1388_v35, %v1483_v24 }
 0x271   :  { %v560_v29 = vpop.xlane.xlu0 %559  ;;  %v1493_v33 = vmul.f32 0.03125, %v498_v44 }
 0x272   :  { %v579_v34 = vmul.f32 0.03125, %v560_v29  ;;  %v713_v37 = vadd.f32 %v1447_v5, %v690_v61  ;;  %v744_v0 = vpack.c.bf16 %v732_v51, %v731_v42 }
 0x273   :  { %v596_v54 = vmul.f32 %v1493_v33, %v1493_v33 }
 0x274   :  { %v611_v41 = vsub.f32 %v579_v34, %v595_v32  ;;  %v562_v45 = vpop.xlane.xlu1 %561  ;;  %v729_v48 = vmax.f32 %v713_v37, 0.0  ;;  %v628_v34 = vsub.f32 %v1399_v39, %v1493_v33 }
 0x275   :  { %v564_v47 = vpop.xlane.xlu0 %563  ;;  %v1168_v52 = vpop.eup %1167  ;;  %v580_v53 = vmul.f32 0.03125, %v562_v45  ;;  %v630_v45 = vsub.f32 %v1391_v36, %v1498_v43 }
 0x276   :  { %v643_v46 = vadd.f32 1e-05, %v611_v41  ;;  %v581_v59 = vmul.f32 0.03125, %v564_v47  ;;  %v743_v58 = vpack.c.bf16 %v730_v50, %v729_v48  ;;  %v673_v55 = vmul.f32 %v1168_v52, %v625_v60  ;;  %v958_v60 = vld [vmem:[%s1594_s7] ss:$0 sm:$0xff] }
 0x277   :  { %v612_v49 = vsub.f32 %v580_v53, %v596_v54  ;;  %v629_v41 = vsub.f32 %v1379_v31, %v1485_v28 }
 0x278   :  { %1175 = vrsqrt.f32 %v643_v46  ;;  %v613_v63 = vsub.f32 %v581_v59, %v597_v38  ;;  %v1170_v1 = vpop.eup %1169  ;;  %1099 = vmatprep.mubr.bf16.mxu0 %v743_v58  ;;  %v566_v22 = vpop.xlane.xlu1 %565  ;;  %v696_v26 = vmul.f32 %v1438_v56, %v673_v55 }
 0x279   :  { %v1172_v2 = vpop.eup %1171  ;;  %v674_v19 = vmul.f32 %v1170_v1, %v626_v62  ;;  %v644_v12 = vadd.f32 1e-05, %v612_v49  ;;  %1100 = vmatmul.mubr.bf16.gmra.mxu0 %v744_v0  ;;  %v582_v20 = vmul.f32 0.03125, %v566_v22 }
 0x27a   :  { %v645_v6 = vadd.f32 1e-05, %v613_v63  ;;  %v671_v21 = vmul.f32 %v1172_v2, %v623_v57  ;;  %v719_v23 = vadd.f32 %v1447_v5, %v696_v26 }
 0x27b   :  { %1177 = vrsqrt.f32 %v644_v12  ;;  %v614_v3 = vsub.f32 %v582_v20, %v598_v4  ;;  %v697_v15 = vmul.f32 %v1438_v56, %v674_v19 }
 0x27c   :  { %v1174_v17 = vpop.eup %1173  ;;  %1179 = vrsqrt.f32 %v645_v6  ;;  %v694_v7 = vmul.f32 %v1438_v56, %v671_v21  ;;  %v735_v61 = vmax.f32 %v719_v23, 0.0 }
 0x27d   :  { %v646_v9 = vadd.f32 1e-05, %v614_v3  ;;  %v672_v10 = vmul.f32 %v1174_v17, %v624_v25  ;;  %v720_v11 = vadd.f32 %v1447_v5, %v697_v15 }
 0x27e   :  { %v717_v16 = vadd.f32 %v1447_v5, %v694_v7 }
 0x27f   :  { %1181 = vrsqrt.f32 %v646_v9  ;;  %v695_v14 = vmul.f32 %v1438_v56, %v672_v10  ;;  %v736_v18 = vmax.f32 %v720_v11, 0.0 }
 0x280   :  { %v733_v8 = vmax.f32 %v717_v16, 0.0 }
 0x281   :  { %v718_v40 = vadd.f32 %v1447_v5, %v695_v14  ;;  %v746_v32 = vpack.c.bf16 %v736_v18, %v735_v61 }
 0x283   :  { %v734_v44 = vmax.f32 %v718_v40, 0.0 }
 0x285   :  { %v1176_v29 = vpop.eup %1175  ;;  %v745_v13 = vpack.c.bf16 %v734_v44, %v733_v8 }
 0x286   :  { %v675_v30 = vmul.f32 %v1176_v29, %v627_v27 }
 0x287   :  { %1103 = vmatprep.mubr.bf16.mxu1 %v745_v13 }
 0x288   :  { %v698_v37 = vmul.f32 %v1438_v56, %v675_v30  ;;  %v1178_v38 = vpop.eup %1177  ;;  %1104 = vmatmul.mubr.bf16.vlgmr.msra.gmra.mxu1 %v746_v32 }
 0x289   :  { %v1180_v42 = vpop.eup %1179  ;;  %v676_v35 = vmul.f32 %v1178_v38, %v628_v34 }
 0x28a   :  { %v677_v24 = vmul.f32 %v1180_v42, %v629_v41  ;;  %v721_v48 = vadd.f32 %v1447_v5, %v698_v37 }
 0x28b   :  { %v699_v47 = vmul.f32 %v1438_v56, %v676_v35 }
 0x28c   :  { %v1182_v50 = vpop.eup %1181  ;;  %v700_v39 = vmul.f32 %v1438_v56, %v677_v24  ;;  %v737_v52 = vmax.f32 %v721_v48, 0.0 }
 0x28d   :  { %v722_v33 = vadd.f32 %v1447_v5, %v699_v47  ;;  %v678_v51 = vmul.f32 %v1182_v50, %v630_v45 }
 0x28e   :  { %v723_v28 = vadd.f32 %v1447_v5, %v700_v39 }
 0x28f   :  { %v738_v54 = vmax.f32 %v722_v33, 0.0  ;;  %v701_v31 = vmul.f32 %v1438_v56, %v678_v51 }
 0x290   :  { %v739_v36 = vmax.f32 %v723_v28, 0.0 }
 0x291   :  { %v747_v46 = vpack.c.bf16 %v738_v54, %v737_v52  ;;  %v724_v53 = vadd.f32 %v1447_v5, %v701_v31 }
 0x293   :  { %1107 = vmatprep.mubr.bf16.mxu1 %v747_v46  ;;  %v740_v43 = vmax.f32 %v724_v53, 0.0 }
 0x295   :  { %v748_v59 = vpack.c.bf16 %v740_v43, %v739_v36 }
 0x297   :  { %1108 = vmatmul.mubr.bf16.gmra.mxu1 %v748_v59 }
 0x32a   :  { %v1097_v62 = vpop.f32.mrf.mxu0 }
 0x32b   :  { %v863_v58 = vadd.f32 %v1097_v62, %v958_v60 }
 0x32c   :  { %v854_v49 = vpop.f32.mrf.mxu0 }
 0x32d   :  { %919 = vst [vmem:[%s1595_s8 + $0x10] sm:$0xff] %v863_v58  ;;  %v855_v56 = vadd.f32 %v958_v60, %v854_v49 }
 0x32e   :  { %v1098_v63 = vpop.f32.mrf.mxu0 }
 0x32f   :  { %917 = vst [vmem:[%s1595_s8] sm:$0xff] %v855_v56  ;;  %v866_v5 = vadd.f32 %v1098_v63, %v958_v60 }
 0x330   :  { %v857_v0 = vpop.f32.mrf.mxu0 }
 0x331   :  { %920 = vst [vmem:[%s1595_s8 + $0x18] sm:$0xff] %v866_v5  ;;  %v858_v1 = vadd.f32 %v958_v60, %v857_v0 }
 0x333   :  { %918 = vst [vmem:[%s1595_s8 + $0x8] sm:$0xff] %v858_v1 }
 0x339   :  { %v1101_v57 = vpop.f32.mrf.mxu0 }
 0x33a   :  { %v879_v55 = vadd.f32 %v1101_v57, %v958_v60 }
 0x33b   :  { %v870_v4 = vpop.f32.mrf.mxu0 }
 0x33c   :  { %923 = vst [vmem:[%s1595_s8 + $0x30] sm:$0xff] %v879_v55  ;;  %v871_v22 = vadd.f32 %v958_v60, %v870_v4 }
 0x33d   :  { %v1102_v2 = vpop.f32.mrf.mxu0 }
 0x33e   :  { %921 = vst [vmem:[%s1595_s8 + $0x20] sm:$0xff] %v871_v22  ;;  %v882_v19 = vadd.f32 %v1102_v2, %v958_v60 }
 0x33f   :  { %v873_v12 = vpop.f32.mrf.mxu0 }
 0x340   :  { %924 = vst [vmem:[%s1595_s8 + $0x38] sm:$0xff] %v882_v19  ;;  %v874_v6 = vadd.f32 %v958_v60, %v873_v12 }
 0x342   :  { %922 = vst [vmem:[%s1595_s8 + $0x28] sm:$0xff] %v874_v6 }
 0x348   :  { %v1105_v20 = vpop.f32.mrf.mxu1 }
 0x349   :  { %v895_v21 = vadd.f32 %v1105_v20, %v958_v60 }
 0x34a   :  { %v886_v25 = vpop.f32.mrf.mxu1 }
 0x34b   :  { %927 = vst [vmem:[%s1595_s8 + $0x50] sm:$0xff] %v895_v21  ;;  %v887_v3 = vadd.f32 %v958_v60, %v886_v25 }
 0x34c   :  { %v1106_v15 = vpop.f32.mrf.mxu1 }
 0x34d   :  { %925 = vst [vmem:[%s1595_s8 + $0x40] sm:$0xff] %v887_v3  ;;  %v898_v17 = vadd.f32 %v1106_v15, %v958_v60 }
 0x34e   :  { %v889_v7 = vpop.f32.mrf.mxu1 }
 0x34f   :  { %928 = vst [vmem:[%s1595_s8 + $0x58] sm:$0xff] %v898_v17  ;;  %v890_v26 = vadd.f32 %v958_v60, %v889_v7 }
 0x351   :  { %926 = vst [vmem:[%s1595_s8 + $0x48] sm:$0xff] %v890_v26 }
 0x357   :  { %v1109_v9 = vpop.f32.mrf.mxu1 }
 0x358   :  { %v911_v10 = vadd.f32 %v1109_v9, %v958_v60 }
 0x359   :  { %v902_v11 = vpop.f32.mrf.mxu1 }
 0x35a   :  { %931 = vst [vmem:[%s1595_s8 + $0x70] sm:$0xff] %v911_v10  ;;  %v903_v14 = vadd.f32 %v958_v60, %v902_v11 }
 0x35b   :  { %v1110_v16 = vpop.f32.mrf.mxu1 }
 0x35c   :  { %929 = vst [vmem:[%s1595_s8 + $0x60] sm:$0xff] %v903_v14  ;;  %v914_v23 = vadd.f32 %v1110_v16, %v958_v60 }
 0x35d   :  { %v905_v40 = vpop.f32.mrf.mxu1 }
 0x35e   :  { %932 = vst [vmem:[%s1595_s8 + $0x78] sm:$0xff] %v914_v23  ;;  %v906_v18 = vadd.f32 %v958_v60, %v905_v40 }
 0x360   :  { %930 = vst [vmem:[%s1595_s8 + $0x68] sm:$0xff] %v906_v18 }

// kernel: agfnn_gin_forward.3
= control target key start
LH: loop header
LB: loop body
LE: loop exit
PB: predicated region body
PF: predicated region fallthrough
CT: control target
= control target key end

     0   :  { %s1706_s1 = inlined_call_operand.vmem [shape: bf16[128,128], index: 1, kind: input, shape index: {}]   ;;  %s1707_s0 = inlined_call_operand.vmem [shape: s8[128,128], index: 0, kind: input, shape index: {}]   ;;  %s1708_s2 = inlined_call_operand.vmem [shape: bf16[128,128], index: 2, kind: input, shape index: {}]   ;;  %s1709_s3 = inlined_call_operand.vmem [shape: f32[1,128], index: 3, kind: input, shape index: {}]   ;;  %s1710_s6 = inlined_call_operand.vmem [shape: bf16[128,128], index: 6, kind: input, shape index: {}]   ;;  %s1711_s4 = inlined_call_operand.vmem [shape: f32[1,128], index: 4, kind: input, shape index: {}]   ;;  %s1712_s5 = inlined_call_operand.vmem [shape: f32[1,128], index: 5, kind: input, shape index: {}]   ;;  %s1713_s7 = inlined_call_operand.vmem [shape: f32[1,128], index: 7, kind: input, shape index: {}]   ;;  %s1714_s8 = inlined_call_operand.vmem [shape: bf16[128,128], index: 8, kind: output, shape index: {}]  }
   0x1   :  { %v1270_v0 = vld [vmem:[%s1706_s1 + $0x38] sm:$0xff]   ;;  %v1271_v1 = vld [vmem:[%s1706_s1 + $0x30] sm:$0xff]   ;;  %v1272_v2 = vld [vmem:[%s1706_s1 + $0x28] sm:$0xff]  }
   0x2   :  { %1158 = vmatprep.subr.bf16.mxu0 %v1270_v0  ;;  %v1273_v3 = vld [vmem:[%s1706_s1 + $0x20] sm:$0xff]   ;;  %v1278_v6 = vld [vmem:[%s1708_s2 + $0x38] sm:$0xff]   ;;  %v1279_v7 = vld [vmem:[%s1708_s2 + $0x30] sm:$0xff]  }
   0x3   :  { %1159 = vmatpush3.bf16.msra.mxu0 %v1270_v0  ;;  %v50_v4 = vld [vmem:[%s1707_s0] sm:$0xff]  ;;  %v1274_v8 = vld [vmem:[%s1706_s1 + $0x18] sm:$0xff]   ;;  %1190 = vmatprep.subr.bf16.mxu1 %v1278_v6  ;;  %v1280_v9 = vld [vmem:[%s1708_s2 + $0x28] sm:$0xff]  }
   0x4   :  { %1160 = vmatprep.subr.bf16.mxu0 %v1271_v1  ;;  %v54_v5 = vunpack.c.l.s8.bf16 %v50_v4  ;;  %1191 = vmatpush3.bf16.msra.mxu1 %v1278_v6  ;;  %v1275_v10 = vld [vmem:[%s1706_s1 + $0x10] sm:$0xff]   ;;  %v1281_v11 = vld [vmem:[%s1708_s2 + $0x20] sm:$0xff]   ;;  %v1276_v12 = vld [vmem:[%s1706_s1 + $0x8] sm:$0xff]   ;;  %v55_v17 = vunpack.c.h.s8.bf16 %v50_v4 }
   0x5   :  { %1192 = vmatprep.subr.bf16.mxu1 %v1279_v7  ;;  %v1282_v13 = vld [vmem:[%s1708_s2 + $0x18] sm:$0xff]   ;;  %v1277_v14 = vld [vmem:[%s1706_s1] sm:$0xff]   ;;  %v1283_v15 = vld [vmem:[%s1708_s2 + $0x10] sm:$0xff]  }
   0x6   :  { %1174 = vmatprep.mubr.bf16.mxu0 %v54_v5  ;;  %v51_v16 = vld [vmem:[%s1707_s0 + $0x8] sm:$0xff]  ;;  %v52_v19 = vld [vmem:[%s1707_s0 + $0x10] sm:$0xff]  ;;  %v53_v22 = vld [vmem:[%s1707_s0 + $0x18] sm:$0xff] }
   0x7   :  { %1161 = vmatpush3.bf16.msra.mxu0 %v1271_v1  ;;  %v56_v18 = vunpack.c.l.s8.bf16 %v51_v16  ;;  %v57_v20 = vunpack.c.h.s8.bf16 %v51_v16  ;;  %v58_v21 = vunpack.c.l.s8.bf16 %v52_v19  ;;  %v59_v23 = vunpack.c.h.s8.bf16 %v52_v19  ;;  %v1284_v26 = vld [vmem:[%s1708_s2 + $0x8] sm:$0xff]   ;;  %v1285_v27 = vld [vmem:[%s1708_s2] sm:$0xff]  }
   0x8   :  { %1162 = vmatprep.subr.bf16.mxu0 %v1272_v2  ;;  %1193 = vmatpush3.bf16.msra.mxu1 %v1279_v7  ;;  %v60_v24 = vunpack.c.l.s8.bf16 %v53_v22  ;;  %v61_v25 = vunpack.c.h.s8.bf16 %v53_v22  ;;  %v1434_v52 = vld [vmem:[%s1709_s3] ss:$0 sm:$0xff] }
   0x9   :  { %1194 = vmatprep.subr.bf16.mxu1 %v1280_v9 }
   0xb   :  { %1163 = vmatpush3.bf16.msra.mxu0 %v1272_v2 }
   0xc   :  { %1164 = vmatprep.subr.bf16.mxu0 %v1273_v3  ;;  %1195 = vmatpush3.bf16.msra.mxu1 %v1280_v9 }
   0xd   :  { %1196 = vmatprep.subr.bf16.mxu1 %v1281_v11 }
   0xf   :  { %1165 = vmatpush3.bf16.msra.mxu0 %v1273_v3 }
  0x10   :  { %1166 = vmatprep.subr.bf16.mxu0 %v1274_v8  ;;  %1197 = vmatpush3.bf16.msra.mxu1 %v1281_v11 }
  0x11   :  { %1198 = vmatprep.subr.bf16.mxu1 %v1282_v13 }
  0x13   :  { %1167 = vmatpush3.bf16.msra.mxu0 %v1274_v8 }
  0x14   :  { %1168 = vmatprep.subr.bf16.mxu0 %v1275_v10  ;;  %1199 = vmatpush3.bf16.msra.mxu1 %v1282_v13  ;;  %v1286_v13 = vld [vmem:[%s1710_s6 + $0x38] sm:$0xff]  }
  0x15   :  { %1200 = vmatprep.subr.bf16.mxu1 %v1283_v15 }
  0x17   :  { %1169 = vmatpush3.bf16.msra.mxu0 %v1275_v10 }
  0x18   :  { %1170 = vmatprep.subr.bf16.mxu0 %v1276_v12  ;;  %1201 = vmatpush3.bf16.msra.mxu1 %v1283_v15 }
  0x19   :  { %1202 = vmatprep.subr.bf16.mxu1 %v1284_v26 }
  0x1b   :  { %1171 = vmatpush3.bf16.msra.mxu0 %v1276_v12 }
  0x1c   :  { %1172 = vmatprep.subr.bf16.mxu0 %v1277_v14  ;;  %1203 = vmatpush3.bf16.msra.mxu1 %v1284_v26 }
  0x1d   :  { %1204 = vmatprep.subr.bf16.mxu1 %v1285_v27 }
  0x1f   :  { %1173 = vmatpush3.bf16.msra.mxu0 %v1277_v14 }
  0x20   :  { %1205 = vmatpush3.bf16.msra.mxu1 %v1285_v27  ;;  %1222 = vmatprep.subr.bf16.mxu0 %v1286_v13 }
  0x21   :  { %1254 = vmatprep.subr.bf16.mxu1 %v1286_v13 }
  0x22   :  { %1175 = vmatmul.mubr.bf16.vlgmr.msra.gmra.mxu0 %v55_v17  ;;  %v1287_v17 = vld [vmem:[%s1710_s6 + $0x30] sm:$0xff]  }
  0x23   :  { %1178 = vmatprep.mubr.bf16.mxu0 %v56_v18  ;;  %1223 = vmatpush3.bf16.msra.mxu0 %v1286_v13 }
  0x24   :  { %1224 = vmatprep.subr.bf16.mxu0 %v1287_v17 }
  0x27   :  { %1225 = vmatpush3.bf16.msra.mxu0 %v1287_v17 }
  0x2a   :  { %1179 = vmatmul.mubr.bf16.gmra.mxu0 %v57_v20 }
  0x2b   :  { %1182 = vmatprep.mubr.bf16.mxu0 %v58_v21  ;;  %v1288_v21 = vld [vmem:[%s1710_s6 + $0x28] sm:$0xff]  }
  0x2c   :  { %1226 = vmatprep.subr.bf16.mxu0 %v1288_v21 }
  0x2d   :  { %1227 = vmatpush3.bf16.msra.mxu0 %v1288_v21 }
  0x32   :  { %1183 = vmatmul.mubr.bf16.gmra.mxu0 %v59_v23 }
  0x33   :  { %1186 = vmatprep.mubr.bf16.mxu0 %v60_v24 }
  0x3a   :  { %1187 = vmatmul.mubr.bf16.gmra.mxu0 %v61_v25  ;;  %v1289_v25 = vld [vmem:[%s1710_s6 + $0x20] sm:$0xff]  }
  0x3b   :  { %1228 = vmatprep.subr.bf16.mxu0 %v1289_v25 }
  0x3c   :  { %1229 = vmatpush3.bf16.msra.mxu0 %v1289_v25 }
  0xe2   :  { %v1176_v28 = vpop.f32.mrf.mxu0 }
  0xe4   :  { %v181_v29 = vpop.f32.mrf.mxu0 }
  0xe6   :  { %v1177_v30 = vpop.f32.mrf.mxu0 }
  0xe7   :  { %v296_v33 = vpack.c.bf16 %v1177_v30, %v1176_v28 }
  0xe8   :  { %v184_v31 = vpop.f32.mrf.mxu0 }
  0xe9   :  { %v295_v32 = vpack.c.bf16 %v184_v31, %v181_v29  ;;  %v1290_v29 = vld [vmem:[%s1710_s6 + $0x18] sm:$0xff]  }
  0xea   :  { %v1180_v34 = vpop.f32.mrf.mxu0  ;;  %1230 = vmatprep.subr.bf16.mxu0 %v1290_v29 }
  0xeb   :  { %1206 = vmatprep.mubr.bf16.mxu1 %v295_v32  ;;  %1231 = vmatpush3.bf16.msra.mxu0 %v1290_v29 }
  0xec   :  { %v197_v35 = vpop.f32.mrf.mxu0  ;;  %1207 = vmatmul.mubr.bf16.vlgmr.msra.gmra.mxu1 %v296_v33  ;;  %v1291_v33 = vld [vmem:[%s1710_s6 + $0x10] sm:$0xff]  }
  0xed   :  { %1262 = vmatpush3.bf16.msra.mxu1 %v1286_v13  ;;  %1232 = vmatprep.subr.bf16.mxu0 %v1291_v33 }
  0xee   :  { %v1181_v36 = vpop.f32.mrf.mxu0  ;;  %1255 = vmatprep.subr.bf16.mxu1 %v1287_v17 }
  0xef   :  { %v298_v39 = vpack.c.bf16 %v1181_v36, %v1180_v34  ;;  %1233 = vmatpush3.bf16.msra.mxu0 %v1291_v33 }
  0xf0   :  { %v200_v37 = vpop.f32.mrf.mxu0 }
  0xf1   :  { %v297_v38 = vpack.c.bf16 %v200_v37, %v197_v35  ;;  %1263 = vmatpush3.bf16.msra.mxu1 %v1287_v17  ;;  %v1292_v37 = vld [vmem:[%s1710_s6 + $0x8] sm:$0xff]  }
  0xf2   :  { %v1184_v40 = vpop.f32.mrf.mxu0  ;;  %1256 = vmatprep.subr.bf16.mxu1 %v1288_v21  ;;  %1234 = vmatprep.subr.bf16.mxu0 %v1292_v37 }
  0xf3   :  { %1210 = vmatprep.mubr.bf16.mxu1 %v297_v38  ;;  %1235 = vmatpush3.bf16.msra.mxu0 %v1292_v37 }
  0xf4   :  { %1211 = vmatmul.mubr.bf16.gmra.mxu1 %v298_v39  ;;  %v213_v41 = vpop.f32.mrf.mxu0 }
  0xf5   :  { %1264 = vmatpush3.bf16.msra.mxu1 %v1288_v21 }
  0xf6   :  { %v1185_v42 = vpop.f32.mrf.mxu0  ;;  %1257 = vmatprep.subr.bf16.mxu1 %v1289_v25 }
  0xf7   :  { %v300_v43 = vpack.c.bf16 %v1185_v42, %v1184_v40 }
  0xf8   :  { %v216_v44 = vpop.f32.mrf.mxu0 }
  0xf9   :  { %v299_v45 = vpack.c.bf16 %v216_v44, %v213_v41  ;;  %1265 = vmatpush3.bf16.msra.mxu1 %v1289_v25  ;;  %v1293_v41 = vld [vmem:[%s1710_s6] sm:$0xff]  }
  0xfa   :  { %v1188_v46 = vpop.f32.mrf.mxu0  ;;  %1258 = vmatprep.subr.bf16.mxu1 %v1290_v29  ;;  %1236 = vmatprep.subr.bf16.mxu0 %v1293_v41 }
  0xfb   :  { %1214 = vmatprep.mubr.bf16.mxu1 %v299_v45  ;;  %1237 = vmatpush3.bf16.msra.mxu0 %v1293_v41 }
  0xfc   :  { %1215 = vmatmul.mubr.bf16.gmra.mxu1 %v300_v43  ;;  %v229_v47 = vpop.f32.mrf.mxu0 }
  0xfd   :  { %1266 = vmatpush3.bf16.msra.mxu1 %v1290_v29 }
  0xfe   :  { %v1189_v48 = vpop.f32.mrf.mxu0  ;;  %1259 = vmatprep.subr.bf16.mxu1 %v1291_v33 }
  0xff   :  { %v302_v49 = vpack.c.bf16 %v1189_v48, %v1188_v46 }
 0x100   :  { %v232_v50 = vpop.f32.mrf.mxu0 }
 0x101   :  { %v301_v51 = vpack.c.bf16 %v232_v50, %v229_v47  ;;  %1267 = vmatpush3.bf16.msra.mxu1 %v1291_v33 }
 0x102   :  { %1260 = vmatprep.subr.bf16.mxu1 %v1292_v37 }
 0x103   :  { %1218 = vmatprep.mubr.bf16.mxu1 %v301_v51 }
 0x104   :  { %1219 = vmatmul.mubr.bf16.gmra.mxu1 %v302_v49 }
 0x105   :  { %1268 = vmatpush3.bf16.msra.mxu1 %v1292_v37 }
 0x106   :  { %1261 = vmatprep.subr.bf16.mxu1 %v1293_v41 }
 0x109   :  { %1269 = vmatpush3.bf16.msra.mxu1 %v1293_v41 }
 0x1ac   :  { %v1208_v53 = vpop.f32.mrf.mxu1 }
 0x1ad   :  { %v1437_v54 = vadd.f32 %v1208_v53, %v1434_v52 }
 0x1ae   :  { %v408_v55 = vpop.f32.mrf.mxu1 }
 0x1af   :  { %475 = vadd.xlane.f32.xlu0 %v1437_v54  ;;  %v1441_v57 = vadd.f32 %v1434_v52, %v408_v55  ;;  %v521_v63 = vmul.f32 %v1437_v54, %v1437_v54 }
 0x1b0   :  { %v1209_v56 = vpop.f32.mrf.mxu1 }
 0x1b1   :  { %v1444_v58 = vadd.f32 %v1209_v56, %v1434_v52  ;;  %v519_v2 = vmul.f32 %v1441_v57, %v1441_v57 }
 0x1b2   :  { %v411_v59 = vpop.f32.mrf.mxu1 }
 0x1b3   :  { %477 = vadd.xlane.f32.xlu1 %v1444_v58  ;;  %471 = vadd.xlane.f32.xlu0 %v1441_v57  ;;  %v1449_v61 = vadd.f32 %v1434_v52, %v411_v59  ;;  %v522_v62 = vmul.f32 %v1444_v58, %v1444_v58 }
 0x1b4   :  { %v1212_v60 = vpop.f32.mrf.mxu1 }
 0x1b5   :  { %v520_v1 = vmul.f32 %v1449_v61, %v1449_v61  ;;  %v1465_v6 = vadd.f32 %v1212_v60, %v1434_v52 }
 0x1b6   :  { %v424_v0 = vpop.f32.mrf.mxu1 }
 0x1b7   :  { %541 = vadd.xlane.f32.xlu1 %v522_v62  ;;  %539 = vadd.xlane.f32.xlu0 %v521_v63  ;;  %v1473_v8 = vadd.f32 %v1434_v52, %v424_v0  ;;  %v525_v12 = vmul.f32 %v1465_v6, %v1465_v6 }
 0x1b8   :  { %v1213_v3 = vpop.f32.mrf.mxu1 }
 0x1b9   :  { %v1460_v4 = vadd.f32 %v1213_v3, %v1434_v52  ;;  %v523_v16 = vmul.f32 %v1473_v8, %v1473_v8 }
 0x1ba   :  { %v427_v5 = vpop.f32.mrf.mxu1 }
 0x1bb   :  { %537 = vadd.xlane.f32.xlu1 %v520_v1  ;;  %535 = vadd.xlane.f32.xlu0 %v519_v2  ;;  %v1468_v7 = vadd.f32 %v1434_v52, %v427_v5  ;;  %v526_v9 = vmul.f32 %v1460_v4, %v1460_v4 }
 0x1bc   :  { %v1216_v10 = vpop.f32.mrf.mxu1 }
 0x1bd   :  { %v524_v11 = vmul.f32 %v1468_v7, %v1468_v7  ;;  %v1495_v19 = vadd.f32 %v1216_v10, %v1434_v52 }
 0x1be   :  { %v440_v14 = vpop.f32.mrf.mxu1 }
 0x1bf   :  { %473 = vadd.xlane.f32.xlu0 %v1449_v61  ;;  %485 = vadd.xlane.f32.xlu1 %v1460_v4  ;;  %v1486_v15 = vadd.f32 %v1434_v52, %v440_v14  ;;  %v529_v24 = vmul.f32 %v1495_v19, %v1495_v19 }
 0x1c0   :  { %v1217_v18 = vpop.f32.mrf.mxu1 }
 0x1c1   :  { %v1498_v20 = vadd.f32 %v1217_v18, %v1434_v52  ;;  %v527_v28 = vmul.f32 %v1486_v15, %v1486_v15 }
 0x1c2   :  { %v443_v22 = vpop.f32.mrf.mxu1 }
 0x1c3   :  { %483 = vadd.xlane.f32.xlu0 %v1465_v6  ;;  %481 = vadd.xlane.f32.xlu1 %v1468_v7  ;;  %v1506_v23 = vadd.f32 %v1434_v52, %v443_v22  ;;  %v530_v27 = vmul.f32 %v1498_v20, %v1498_v20 }
 0x1c4   :  { %v1220_v26 = vpop.f32.mrf.mxu1 }
 0x1c5   :  { %v1522_v31 = vadd.f32 %v1220_v26, %v1434_v52  ;;  %v528_v32 = vmul.f32 %v1506_v23, %v1506_v23 }
 0x1c6   :  { %v456_v30 = vpop.f32.mrf.mxu1 }
 0x1c7   :  { %549 = vadd.xlane.f32.xlu1 %v526_v9  ;;  %479 = vadd.xlane.f32.xlu0 %v1473_v8  ;;  %v1531_v35 = vadd.f32 %v1434_v52, %v456_v30  ;;  %v533_v43 = vmul.f32 %v1522_v31, %v1522_v31 }
 0x1c8   :  { %v1221_v34 = vpop.f32.mrf.mxu1 }
 0x1c9   :  { %v1534_v36 = vadd.f32 %v1221_v34, %v1434_v52  ;;  %v531_v40 = vmul.f32 %v1531_v35, %v1531_v35 }
 0x1ca   :  { %v459_v38 = vpop.f32.mrf.mxu1 }
 0x1cb   :  { %545 = vadd.xlane.f32.xlu1 %v524_v11  ;;  %547 = vadd.xlane.f32.xlu0 %v525_v12  ;;  %v1542_v39 = vadd.f32 %v1434_v52, %v459_v38  ;;  %v534_v44 = vmul.f32 %v1534_v36, %v1534_v36 }
 0x1cd   :  { %v532_v42 = vmul.f32 %v1542_v39, %v1542_v39 }
 0x1cf   :  { %543 = vadd.xlane.f32.xlu0 %v523_v16  ;;  %487 = vadd.xlane.f32.xlu1 %v1486_v15 }
 0x1d3   :  { %491 = vadd.xlane.f32.xlu0 %v1495_v19  ;;  %493 = vadd.xlane.f32.xlu1 %v1498_v20 }
 0x1d7   :  { %555 = vadd.xlane.f32.xlu0 %v529_v24  ;;  %489 = vadd.xlane.f32.xlu1 %v1506_v23 }
 0x1db   :  { %557 = vadd.xlane.f32.xlu1 %v530_v27  ;;  %551 = vadd.xlane.f32.xlu0 %v527_v28 }
 0x1df   :  { %553 = vadd.xlane.f32.xlu1 %v528_v32  ;;  %499 = vadd.xlane.f32.xlu0 %v1522_v31 }
 0x1e3   :  { %501 = vadd.xlane.f32.xlu1 %v1534_v36  ;;  %495 = vadd.xlane.f32.xlu0 %v1531_v35 }
 0x1e7   :  { %497 = vadd.xlane.f32.xlu1 %v1542_v39  ;;  %559 = vadd.xlane.f32.xlu0 %v531_v40 }
 0x1eb   :  { %561 = vadd.xlane.f32.xlu1 %v532_v42  ;;  %563 = vadd.xlane.f32.xlu0 %v533_v43 }
 0x1ef   :  { %565 = vadd.xlane.f32.xlu1 %v534_v44 }
 0x238   :  { %v476_v45 = vpop.xlane.xlu0 %475 }
 0x239   :  { %v505_v46 = vmul.f32 0.03125, %v476_v45 }
 0x23b   :  { %v585_v50 = vmul.f32 %v505_v46, %v505_v46  ;;  %v617_v34 = vsub.f32 %v1437_v54, %v505_v46 }
 0x23c   :  { %v478_v47 = vpop.xlane.xlu1 %477  ;;  %v472_v48 = vpop.xlane.xlu0 %471 }
 0x23d   :  { %v506_v49 = vmul.f32 0.03125, %v478_v47  ;;  %v1556_v55 = vmul.f32 0.03125, %v472_v48 }
 0x23f   :  { %v586_v53 = vmul.f32 %v506_v49, %v506_v49  ;;  %v583_v1 = vmul.f32 %v1556_v55, %v1556_v55  ;;  %v618_v48 = vsub.f32 %v1444_v58, %v506_v49  ;;  %v615_v46 = vsub.f32 %v1441_v57, %v1556_v55 }
 0x240   :  { %v542_v51 = vpop.xlane.xlu1 %541  ;;  %v540_v52 = vpop.xlane.xlu0 %539 }
 0x241   :  { %v570_v56 = vmul.f32 0.03125, %v542_v51  ;;  %v569_v59 = vmul.f32 0.03125, %v540_v52 }
 0x243   :  { %v602_v60 = vsub.f32 %v570_v56, %v586_v53  ;;  %v601_v62 = vsub.f32 %v569_v59, %v585_v50  ;;  %v1581_v56 = vld [vmem:[%s1711_s4] ss:$0 sm:$0xff] }
 0x244   :  { %v538_v63 = vpop.xlane.xlu1 %537  ;;  %v536_v0 = vpop.xlane.xlu0 %535 }
 0x245   :  { %v634_v2 = vadd.f32 1e-05, %v602_v60  ;;  %v633_v3 = vadd.f32 1e-05, %v601_v62  ;;  %v567_v5 = vmul.f32 0.03125, %v536_v0  ;;  %v568_v14 = vmul.f32 0.03125, %v538_v63 }
 0x247   :  { %1294 = vrsqrt.f32 %v634_v2  ;;  %v599_v9 = vsub.f32 %v567_v5, %v583_v1  ;;  %v1590_v5 = vld [vmem:[%s1712_s5] ss:$0 sm:$0xff] }
 0x248   :  { %1296 = vrsqrt.f32 %v633_v3  ;;  %v474_v10 = vpop.xlane.xlu0 %473  ;;  %v486_v11 = vpop.xlane.xlu1 %485 }
 0x249   :  { %v631_v12 = vadd.f32 1e-05, %v599_v9  ;;  %v504_v13 = vmul.f32 0.03125, %v474_v10  ;;  %v1560_v22 = vmul.f32 0.03125, %v486_v11 }
 0x24b   :  { %1298 = vrsqrt.f32 %v631_v12  ;;  %v584_v16 = vmul.f32 %v504_v13, %v504_v13  ;;  %v590_v29 = vmul.f32 %v1560_v22, %v1560_v22  ;;  %v616_v10 = vsub.f32 %v1449_v61, %v504_v13 }
 0x24c   :  { %v484_v17 = vpop.xlane.xlu0 %483  ;;  %v482_v18 = vpop.xlane.xlu1 %481 }
 0x24d   :  { %v600_v21 = vsub.f32 %v568_v14, %v584_v16  ;;  %v1562_v25 = vmul.f32 0.03125, %v484_v17  ;;  %v1564_v26 = vmul.f32 0.03125, %v482_v18 }
 0x24f   :  { %v632_v24 = vadd.f32 1e-05, %v600_v21  ;;  %v589_v37 = vmul.f32 %v1562_v25, %v1562_v25  ;;  %v588_v38 = vmul.f32 %v1564_v26, %v1564_v26 }
 0x250   :  { %v550_v27 = vpop.xlane.xlu1 %549  ;;  %v480_v28 = vpop.xlane.xlu0 %479 }
 0x251   :  { %1300 = vrsqrt.f32 %v632_v24  ;;  %v574_v30 = vmul.f32 0.03125, %v550_v27  ;;  %v1573_v44 = vmul.f32 0.03125, %v480_v28 }
 0x253   :  { %v606_v32 = vsub.f32 %v574_v30, %v590_v29  ;;  %v587_v62 = vmul.f32 %v1573_v44, %v1573_v44 }
 0x254   :  { %v1295_v33 = vpop.eup %1294  ;;  %v546_v40 = vpop.xlane.xlu1 %545 }
 0x255   :  { %v548_v41 = vpop.xlane.xlu0 %547  ;;  %v1297_v42 = vpop.eup %1296  ;;  %v638_v43 = vadd.f32 1e-05, %v606_v32  ;;  %v572_v45 = vmul.f32 0.03125, %v546_v40  ;;  %v666_v53 = vmul.f32 %v1295_v33, %v618_v48 }
 0x256   :  { %v573_v47 = vmul.f32 0.03125, %v548_v41  ;;  %v665_v50 = vmul.f32 %v1297_v42, %v617_v34 }
 0x257   :  { %v604_v51 = vsub.f32 %v572_v45, %v588_v38  ;;  %1302 = vrsqrt.f32 %v638_v43  ;;  %v689_v9 = vmul.f32 %v1581_v56, %v666_v53 }
 0x258   :  { %v605_v52 = vsub.f32 %v573_v47, %v589_v37  ;;  %v1299_v54 = vpop.eup %1298  ;;  %v488_v60 = vpop.xlane.xlu1 %487  ;;  %v688_v57 = vmul.f32 %v1581_v56, %v665_v50 }
 0x259   :  { %v544_v59 = vpop.xlane.xlu0 %543  ;;  %v636_v58 = vadd.f32 1e-05, %v604_v51  ;;  %v663_v0 = vmul.f32 %v1299_v54, %v615_v46  ;;  %v1596_v17 = vmul.f32 0.03125, %v488_v60  ;;  %v712_v29 = vadd.f32 %v1590_v5, %v689_v9 }
 0x25a   :  { %v637_v49 = vadd.f32 1e-05, %v605_v52  ;;  %v571_v63 = vmul.f32 0.03125, %v544_v59  ;;  %v711_v18 = vadd.f32 %v1590_v5, %v688_v57  ;;  %v622_v54 = vsub.f32 %v1460_v4, %v1560_v22 }
 0x25b   :  { %1304 = vrsqrt.f32 %v636_v58  ;;  %v686_v3 = vmul.f32 %v1581_v56, %v663_v0  ;;  %v591_v32 = vmul.f32 %v1596_v17, %v1596_v17  ;;  %v728_v45 = vmax.f32 %v712_v29, 0.0 }
 0x25c   :  { %v603_v1 = vsub.f32 %v571_v63, %v587_v62  ;;  %1306 = vrsqrt.f32 %v637_v49  ;;  %v494_v2 = vpop.xlane.xlu1 %493  ;;  %v727_v37 = vmax.f32 %v711_v18, 0.0  ;;  %v621_v46 = vsub.f32 %v1465_v6, %v1562_v25 }
 0x25d   :  { %v492_v55 = vpop.xlane.xlu0 %491  ;;  %v1599_v21 = vmul.f32 0.03125, %v494_v2  ;;  %v709_v28 = vadd.f32 %v1590_v5, %v686_v3  ;;  %v620_v58 = vsub.f32 %v1468_v7, %v1564_v26  ;;  %v619_v3 = vsub.f32 %v1473_v8, %v1573_v44 }
 0x25e   :  { %v635_v11 = vadd.f32 1e-05, %v603_v1  ;;  %v1594_v12 = vmul.f32 0.03125, %v492_v55  ;;  %v1301_v14 = vpop.eup %1300  ;;  %v742_v0 = vpack.c.bf16 %v728_v45, %v727_v37 }
 0x25f   :  { %v664_v16 = vmul.f32 %v1301_v14, %v616_v10  ;;  %v594_v38 = vmul.f32 %v1599_v21, %v1599_v21  ;;  %v725_v43 = vmax.f32 %v709_v28, 0.0 }
 0x260   :  { %1308 = vrsqrt.f32 %v635_v11  ;;  %v490_v27 = vpop.xlane.xlu1 %489  ;;  %v593_v13 = vmul.f32 %v1594_v12, %v1594_v12 }
 0x261   :  { %v556_v24 = vpop.xlane.xlu0 %555  ;;  %v687_v61 = vmul.f32 %v1581_v56, %v664_v16  ;;  %v1611_v40 = vmul.f32 0.03125, %v490_v27 }
 0x262   :  { %v577_v30 = vmul.f32 0.03125, %v556_v24 }
 0x263   :  { %v710_v34 = vadd.f32 %v1590_v5, %v687_v61  ;;  %v592_v55 = vmul.f32 %v1611_v40, %v1611_v40 }
 0x264   :  { %v609_v33 = vsub.f32 %v577_v30, %v593_v13  ;;  %v558_v41 = vpop.xlane.xlu1 %557  ;;  %v1303_v47 = vpop.eup %1302 }
 0x265   :  { %v552_v42 = vpop.xlane.xlu0 %551  ;;  %v578_v50 = vmul.f32 0.03125, %v558_v41  ;;  %v726_v52 = vmax.f32 %v710_v34, 0.0  ;;  %v670_v1 = vmul.f32 %v1303_v47, %v622_v54 }
 0x266   :  { %v641_v48 = vadd.f32 1e-05, %v609_v33  ;;  %v575_v51 = vmul.f32 0.03125, %v552_v42 }
 0x267   :  { %v610_v53 = vsub.f32 %v578_v50, %v594_v38  ;;  %v741_v60 = vpack.c.bf16 %v726_v52, %v725_v43  ;;  %v693_v16 = vmul.f32 %v1581_v56, %v670_v1 }
 0x268   :  { %v607_v59 = vsub.f32 %v575_v51, %v591_v32  ;;  %v1305_v62 = vpop.eup %1304  ;;  %1310 = vrsqrt.f32 %v641_v48  ;;  %v554_v49 = vpop.xlane.xlu1 %553 }
 0x269   :  { %v500_v63 = vpop.xlane.xlu0 %499  ;;  %v1307_v57 = vpop.eup %1306  ;;  %v642_v4 = vadd.f32 1e-05, %v610_v53  ;;  %v576_v2 = vmul.f32 0.03125, %v554_v49  ;;  %1238 = vmatprep.mubr.bf16.mxu0 %v741_v60  ;;  %v668_v6 = vmul.f32 %v1305_v62, %v620_v58  ;;  %v716_v30 = vadd.f32 %v1590_v5, %v693_v16 }
 0x26a   :  { %v639_v22 = vadd.f32 1e-05, %v607_v59  ;;  %1239 = vmatmul.mubr.bf16.vlgmr.msra.gmra.mxu0 %v742_v0  ;;  %v669_v25 = vmul.f32 %v1307_v57, %v621_v46  ;;  %v1628_v28 = vmul.f32 0.03125, %v500_v63  ;;  %v625_v60 = vsub.f32 %v1495_v19, %v1594_v12 }
 0x26b   :  { %1312 = vrsqrt.f32 %v642_v4  ;;  %v608_v7 = vsub.f32 %v576_v2, %v592_v55  ;;  %v691_v11 = vmul.f32 %v1581_v56, %v668_v6  ;;  %v732_v51 = vmax.f32 %v716_v30, 0.0 }
 0x26c   :  { %1314 = vrsqrt.f32 %v639_v22  ;;  %v502_v9 = vpop.xlane.xlu1 %501  ;;  %v692_v14 = vmul.f32 %v1581_v56, %v669_v25  ;;  %v597_v38 = vmul.f32 %v1628_v28, %v1628_v28  ;;  %v626_v62 = vsub.f32 %v1498_v20, %v1599_v21 }
 0x26d   :  { %v1309_v26 = vpop.eup %1308  ;;  %v496_v10 = vpop.xlane.xlu0 %495  ;;  %v640_v18 = vadd.f32 1e-05, %v608_v7  ;;  %v714_v13 = vadd.f32 %v1590_v5, %v691_v11  ;;  %v1641_v43 = vmul.f32 0.03125, %v502_v9  ;;  %v623_v57 = vsub.f32 %v1486_v15, %v1596_v17 }
 0x26e   :  { %v1626_v24 = vmul.f32 0.03125, %v496_v10  ;;  %v667_v27 = vmul.f32 %v1309_v26, %v619_v3  ;;  %v715_v8 = vadd.f32 %v1590_v5, %v692_v14  ;;  %v624_v25 = vsub.f32 %v1506_v23, %v1611_v40 }
 0x26f   :  { %1316 = vrsqrt.f32 %v640_v18  ;;  %v730_v50 = vmax.f32 %v714_v13, 0.0  ;;  %v598_v4 = vmul.f32 %v1641_v43, %v1641_v43 }
 0x270   :  { %v498_v44 = vpop.xlane.xlu1 %497  ;;  %v690_v61 = vmul.f32 %v1581_v56, %v667_v27  ;;  %v595_v32 = vmul.f32 %v1626_v24, %v1626_v24  ;;  %v731_v42 = vmax.f32 %v715_v8, 0.0  ;;  %v627_v27 = vsub.f32 %v1531_v35, %v1626_v24 }
 0x271   :  { %v560_v29 = vpop.xlane.xlu0 %559  ;;  %v1636_v33 = vmul.f32 0.03125, %v498_v44 }
 0x272   :  { %v579_v34 = vmul.f32 0.03125, %v560_v29  ;;  %v713_v37 = vadd.f32 %v1590_v5, %v690_v61  ;;  %v744_v0 = vpack.c.bf16 %v732_v51, %v731_v42 }
 0x273   :  { %v596_v54 = vmul.f32 %v1636_v33, %v1636_v33 }
 0x274   :  { %v611_v41 = vsub.f32 %v579_v34, %v595_v32  ;;  %v562_v45 = vpop.xlane.xlu1 %561  ;;  %v729_v48 = vmax.f32 %v713_v37, 0.0  ;;  %v628_v34 = vsub.f32 %v1542_v39, %v1636_v33 }
 0x275   :  { %v564_v47 = vpop.xlane.xlu0 %563  ;;  %v1311_v52 = vpop.eup %1310  ;;  %v580_v53 = vmul.f32 0.03125, %v562_v45  ;;  %v630_v45 = vsub.f32 %v1534_v36, %v1641_v43 }
 0x276   :  { %v643_v46 = vadd.f32 1e-05, %v611_v41  ;;  %v581_v59 = vmul.f32 0.03125, %v564_v47  ;;  %v743_v58 = vpack.c.bf16 %v730_v50, %v729_v48  ;;  %v673_v55 = vmul.f32 %v1311_v52, %v625_v60 }
 0x277   :  { %v612_v49 = vsub.f32 %v580_v53, %v596_v54  ;;  %v629_v41 = vsub.f32 %v1522_v31, %v1628_v28 }
 0x278   :  { %1318 = vrsqrt.f32 %v643_v46  ;;  %v613_v63 = vsub.f32 %v581_v59, %v597_v38  ;;  %v1313_v1 = vpop.eup %1312  ;;  %1242 = vmatprep.mubr.bf16.mxu0 %v743_v58  ;;  %v566_v22 = vpop.xlane.xlu1 %565  ;;  %v696_v26 = vmul.f32 %v1581_v56, %v673_v55 }
 0x279   :  { %v1315_v2 = vpop.eup %1314  ;;  %v674_v19 = vmul.f32 %v1313_v1, %v626_v62  ;;  %v644_v12 = vadd.f32 1e-05, %v612_v49  ;;  %1243 = vmatmul.mubr.bf16.gmra.mxu0 %v744_v0  ;;  %v582_v20 = vmul.f32 0.03125, %v566_v22  ;;  %v1022_v62 = vld [vmem:[%s1713_s7] ss:$0 sm:$0xff] }
 0x27a   :  { %v645_v6 = vadd.f32 1e-05, %v613_v63  ;;  %v671_v21 = vmul.f32 %v1315_v2, %v623_v57  ;;  %v719_v23 = vadd.f32 %v1590_v5, %v696_v26 }
 0x27b   :  { %1320 = vrsqrt.f32 %v644_v12  ;;  %v614_v3 = vsub.f32 %v582_v20, %v598_v4  ;;  %v697_v15 = vmul.f32 %v1581_v56, %v674_v19 }
 0x27c   :  { %v1317_v17 = vpop.eup %1316  ;;  %1322 = vrsqrt.f32 %v645_v6  ;;  %v694_v7 = vmul.f32 %v1581_v56, %v671_v21  ;;  %v735_v61 = vmax.f32 %v719_v23, 0.0 }
 0x27d   :  { %v646_v9 = vadd.f32 1e-05, %v614_v3  ;;  %v672_v10 = vmul.f32 %v1317_v17, %v624_v25  ;;  %v720_v11 = vadd.f32 %v1590_v5, %v697_v15 }
 0x27e   :  { %v717_v16 = vadd.f32 %v1590_v5, %v694_v7 }
 0x27f   :  { %1324 = vrsqrt.f32 %v646_v9  ;;  %v695_v14 = vmul.f32 %v1581_v56, %v672_v10  ;;  %v736_v18 = vmax.f32 %v720_v11, 0.0 }
 0x280   :  { %v733_v8 = vmax.f32 %v717_v16, 0.0 }
 0x281   :  { %v718_v40 = vadd.f32 %v1590_v5, %v695_v14  ;;  %v746_v32 = vpack.c.bf16 %v736_v18, %v735_v61 }
 0x283   :  { %v734_v44 = vmax.f32 %v718_v40, 0.0 }
 0x285   :  { %v1319_v29 = vpop.eup %1318  ;;  %v745_v13 = vpack.c.bf16 %v734_v44, %v733_v8 }
 0x286   :  { %v675_v30 = vmul.f32 %v1319_v29, %v627_v27 }
 0x287   :  { %1246 = vmatprep.mubr.bf16.mxu1 %v745_v13 }
 0x288   :  { %v698_v37 = vmul.f32 %v1581_v56, %v675_v30  ;;  %v1321_v38 = vpop.eup %1320  ;;  %1247 = vmatmul.mubr.bf16.vlgmr.msra.gmra.mxu1 %v746_v32 }
 0x289   :  { %v1323_v42 = vpop.eup %1322  ;;  %v676_v35 = vmul.f32 %v1321_v38, %v628_v34 }
 0x28a   :  { %v677_v24 = vmul.f32 %v1323_v42, %v629_v41  ;;  %v721_v48 = vadd.f32 %v1590_v5, %v698_v37 }
 0x28b   :  { %v699_v47 = vmul.f32 %v1581_v56, %v676_v35 }
 0x28c   :  { %v1325_v50 = vpop.eup %1324  ;;  %v700_v39 = vmul.f32 %v1581_v56, %v677_v24  ;;  %v737_v52 = vmax.f32 %v721_v48, 0.0 }
 0x28d   :  { %v722_v33 = vadd.f32 %v1590_v5, %v699_v47  ;;  %v678_v51 = vmul.f32 %v1325_v50, %v630_v45 }
 0x28e   :  { %v723_v28 = vadd.f32 %v1590_v5, %v700_v39 }
 0x28f   :  { %v738_v54 = vmax.f32 %v722_v33, 0.0  ;;  %v701_v31 = vmul.f32 %v1581_v56, %v678_v51 }
 0x290   :  { %v739_v36 = vmax.f32 %v723_v28, 0.0 }
 0x291   :  { %v747_v46 = vpack.c.bf16 %v738_v54, %v737_v52  ;;  %v724_v53 = vadd.f32 %v1590_v5, %v701_v31 }
 0x293   :  { %1250 = vmatprep.mubr.bf16.mxu1 %v747_v46  ;;  %v740_v43 = vmax.f32 %v724_v53, 0.0 }
 0x295   :  { %v748_v59 = vpack.c.bf16 %v740_v43, %v739_v36 }
 0x297   :  { %1251 = vmatmul.mubr.bf16.gmra.mxu1 %v748_v59 }
 0x32a   :  { %v1240_v60 = vpop.f32.mrf.mxu0 }
 0x32b   :  { %v863_v63 = vadd.f32 %v1240_v60, %v1022_v62 }
 0x32c   :  { %v854_v58 = vpop.f32.mrf.mxu0 }
 0x32d   :  { %v855_v1 = vadd.f32 %v1022_v62, %v854_v58 }
 0x32e   :  { %v1241_v49 = vpop.f32.mrf.mxu0 }
 0x32f   :  { %v866_v0 = vadd.f32 %v1241_v49, %v1022_v62 }
 0x330   :  { %v857_v56 = vpop.f32.mrf.mxu0 }
 0x331   :  { %v1071_v57 = vpack.c.bf16 %v866_v0, %v863_v63  ;;  %v858_v55 = vadd.f32 %v1022_v62, %v857_v56 }
 0x333   :  { %1103 = vst [vmem:[%s1714_s8 + $0x8] sm:$0xff] %v1071_v57   ;;  %v1066_v5 = vpack.c.bf16 %v858_v55, %v855_v1 }
 0x335   :  { %1067 = vst [vmem:[%s1714_s8] sm:$0xff] %v1066_v5  }
 0x339   :  { %v1244_v4 = vpop.f32.mrf.mxu0 }
 0x33a   :  { %v879_v19 = vadd.f32 %v1244_v4, %v1022_v62 }
 0x33b   :  { %v870_v22 = vpop.f32.mrf.mxu0 }
 0x33c   :  { %v871_v20 = vadd.f32 %v1022_v62, %v870_v22 }
 0x33d   :  { %v1245_v2 = vpop.f32.mrf.mxu0 }
 0x33e   :  { %v882_v12 = vadd.f32 %v1245_v2, %v1022_v62 }
 0x33f   :  { %v873_v6 = vpop.f32.mrf.mxu0 }
 0x340   :  { %v1081_v21 = vpack.c.bf16 %v882_v12, %v879_v19  ;;  %v874_v25 = vadd.f32 %v1022_v62, %v873_v6 }
 0x342   :  { %1105 = vst [vmem:[%s1714_s8 + $0x18] sm:$0xff] %v1081_v21   ;;  %v1076_v3 = vpack.c.bf16 %v874_v25, %v871_v20 }
 0x344   :  { %1104 = vst [vmem:[%s1714_s8 + $0x10] sm:$0xff] %v1076_v3  }
 0x348   :  { %v1248_v15 = vpop.f32.mrf.mxu1 }
 0x349   :  { %v895_v26 = vadd.f32 %v1248_v15, %v1022_v62 }
 0x34a   :  { %v886_v17 = vpop.f32.mrf.mxu1 }
 0x34b   :  { %v887_v11 = vadd.f32 %v1022_v62, %v886_v17 }
 0x34c   :  { %v1249_v7 = vpop.f32.mrf.mxu1 }
 0x34d   :  { %v898_v9 = vadd.f32 %v1249_v7, %v1022_v62 }
 0x34e   :  { %v889_v10 = vpop.f32.mrf.mxu1 }
 0x34f   :  { %v1091_v14 = vpack.c.bf16 %v898_v9, %v895_v26  ;;  %v890_v16 = vadd.f32 %v1022_v62, %v889_v10 }
 0x351   :  { %1107 = vst [vmem:[%s1714_s8 + $0x28] sm:$0xff] %v1091_v14   ;;  %v1086_v23 = vpack.c.bf16 %v890_v16, %v887_v11 }
 0x353   :  { %1106 = vst [vmem:[%s1714_s8 + $0x20] sm:$0xff] %v1086_v23  }
 0x357   :  { %v1252_v40 = vpop.f32.mrf.mxu1 }
 0x358   :  { %v911_v8 = vadd.f32 %v1252_v40, %v1022_v62 }
 0x359   :  { %v902_v18 = vpop.f32.mrf.mxu1 }
 0x35a   :  { %v903_v61 = vadd.f32 %v1022_v62, %v902_v18 }
 0x35b   :  { %v1253_v27 = vpop.f32.mrf.mxu1 }
 0x35c   :  { %v914_v44 = vadd.f32 %v1253_v27, %v1022_v62 }
 0x35d   :  { %v905_v29 = vpop.f32.mrf.mxu1 }
 0x35e   :  { %v1101_v13 = vpack.c.bf16 %v914_v44, %v911_v8  ;;  %v906_v30 = vadd.f32 %v1022_v62, %v905_v29 }
 0x360   :  { %1109 = vst [vmem:[%s1714_s8 + $0x38] sm:$0xff] %v1101_v13   ;;  %v1096_v32 = vpack.c.bf16 %v906_v30, %v903_v61 }
 0x362   :  { %1108 = vst [vmem:[%s1714_s8 + $0x30] sm:$0xff] %v1096_v32  }

</bundles_post_ra>
